<compile_context>
chip_gen: v7x
topology: tpu7x:2x2x1
jax: 0.10.0
libtpu: 0.0.40
codegen_flags: <defaults>
</compile_context>

<pallas_src>
import functools

import jax
import jax.numpy as jnp
from jax.experimental import pallas as pl
from jax.experimental.pallas import tpu as pltpu

MEAN = jnp.array([-0.03, -0.088, -0.188], dtype=jnp.float32)
STD = jnp.array([0.458, 0.448, 0.45], dtype=jnp.float32)
EPS = 1e-10


# ------------------------------ fused kernel --------------------------------


def _fused_basenet_kernel(x_ref, mt_ref, ist_ref, w1_ref, b1_ref, e1_ref,
                          w2_ref, b2_ref, e2_ref, o1_ref, o2_ref,
                          pad1_ref, pad2_ref, *, BB, H, W, C_IN, C1, C2):
    # x_ref   : (BB, H, W*C_IN)      lane-dense input slab (channel-minor)
    # mt_ref  : (1, W*C_IN)  lane-tiled mean       ist_ref: lane-tiled 1/std
    # w1_ref  : (3, W*C_IN, W*C1)    banded lane matrices, one per dy
    # w2_ref  : (3, W*C1,  W*C2)
    # b1_ref  : (1, W*C1)  b2_ref: (1, W*C2)       lane-tiled biases
    # e1_ref  : (W*C1, W*C1)  e2_ref: (W*C2, W*C2) block-diag ones (channel sums)
    # o1_ref  : (BB, H, W*C1)   o2_ref: (BB, H, W*C2)   lane-dense outputs
    # pad1_ref: VMEM (BB, H+2, W*C_IN)   pad2_ref: VMEM (BB, H+2, W*C1)
    M = BB * H

    # ---- z-score prologue (elementwise, lane-dense, multiply by 1/std) -----
    xz = (x_ref[...] - mt_ref[...]) * ist_ref[...]            # (BB, H, W*C_IN)

    # ---- row halo: zero only the 2 border rows (interior overwritten) ------
    zrow1 = jnp.zeros((BB, 1, W * C_IN), jnp.float32)
    pad1_ref[:, pl.ds(0, 1), :] = zrow1
    pad1_ref[:, pl.ds(H + 1, 1), :] = zrow1
    pad1_ref[:, pl.ds(1, H), :] = xz

    # ---- conv1: 3 accumulated lane-space matmuls (dy = 0,1,2) --------------
    a1 = jnp.dot(pad1_ref[:, pl.ds(0, H), :].reshape(M, W * C_IN), w1_ref[0],
                 preferred_element_type=jnp.float32)
    a1 = a1 + jnp.dot(pad1_ref[:, pl.ds(1, H), :].reshape(M, W * C_IN),
                      w1_ref[1], preferred_element_type=jnp.float32)
    a1 = a1 + jnp.dot(pad1_ref[:, pl.ds(2, H), :].reshape(M, W * C_IN),
                      w1_ref[2], preferred_element_type=jnp.float32)
    a1 = jnp.maximum(a1 + b1_ref[...], 0.0)                   # (M, W*C1) ReLU

    # ---- normalize_activation #1: channel L2 via block-diag ones matmul ----
    s1 = jnp.dot(a1 * a1, e1_ref[...], preferred_element_type=jnp.float32)
    y1 = a1 * pl.reciprocal(jnp.sqrt(s1) + EPS, approx=False)
    o1_ref[...] = y1.reshape(BB, H, W * C1)                    # lane width 128

    # ---- conv2 directly on a1 (stays in VMEM, no HBM round trip) -----------
    zrow2 = jnp.zeros((BB, 1, W * C1), jnp.float32)
    pad2_ref[:, pl.ds(0, 1), :] = zrow2
    pad2_ref[:, pl.ds(H + 1, 1), :] = zrow2
    pad2_ref[:, pl.ds(1, H), :] = a1.reshape(BB, H, W * C1)

    a2 = jnp.dot(pad2_ref[:, pl.ds(0, H), :].reshape(M, W * C1), w2_ref[0],
                 preferred_element_type=jnp.float32)
    a2 = a2 + jnp.dot(pad2_ref[:, pl.ds(1, H), :].reshape(M, W * C1),
                      w2_ref[1], preferred_element_type=jnp.float32)
    a2 = a2 + jnp.dot(pad2_ref[:, pl.ds(2, H), :].reshape(M, W * C1),
                      w2_ref[2], preferred_element_type=jnp.float32)
    a2 = jnp.maximum(a2 + b2_ref[...], 0.0)                   # (M, W*C2) ReLU

    # ---- normalize_activation #2 --------------------------------------------
    s2 = jnp.dot(a2 * a2, e2_ref[...], preferred_element_type=jnp.float32)
    y2 = a2 * pl.reciprocal(jnp.sqrt(s2) + EPS, approx=False)
    o2_ref[...] = y2.reshape(BB, H, W * C2)                    # lane width 256


# ----------------------- wrapper-side constant builders ----------------------


def _conv_lane_matrices(w, W):
    """3x3 'same' conv (HWIO weights) -> 3 banded matrices over the lane axis.

    Returns mats of shape (3, W*Cin, W*Cout) with
      mats[dy][u*Cin+ci, x*Cout+co] = w[dy, u-x+1, ci, co]  for |u-x| <= 1,
    zero otherwise, so the horizontal/channel contraction is a single matmul
    in the lane-dense (rows=H, lanes=W*C) layout and dy becomes a sublane
    shift.  NOTE: PyTorch OIHW checkpoints must be permuted (2,3,1,0) to HWIO.
    """
    _, _, cin, cout = w.shape
    u = jnp.arange(W)[:, None]
    x = jnp.arange(W)[None, :]
    dx = u - x + 1                                   # valid when 0 <= dx <= 2
    valid = ((dx >= 0) & (dx <= 2)).astype(w.dtype)[..., None, None]
    sel = jnp.clip(dx, 0, 2)
    mats = []
    for dy in range(3):
        t = w[dy][sel] * valid                       # (W, W, Cin, Cout)
        mats.append(jnp.transpose(t, (0, 2, 1, 3)).reshape(W * cin, W * cout))
    return jnp.stack(mats, axis=0).astype(jnp.float32)


def _channel_sum_matrix(W, C):
    """Block-diagonal ones (W*C, W*C): per-pixel channel sum broadcast back."""
    idx = jnp.arange(W * C) // C
    return (idx[:, None] == idx[None, :]).astype(jnp.float32)


def _pick_images_per_step(B):
    # Amortize per-step pipeline overhead with several images per step, but
    # keep >= 2 grid steps so both v7x TensorCores get work.
    if B < 2:
        return 1
    bb = min(max(1, B // 2), 8)
    while B % bb != 0:
        bb -= 1
    return bb


def _pick_vmem_limit():
    try:
        cap = int(pltpu.get_tpu_info().vmem_capacity_bytes)
    except Exception:
        cap = 64 * 1024 * 1024
    return int(min(cap * 3 // 4, 100 * 1024 * 1024))


# -------------------------------- wrapper ------------------------------------


def init_params(key, c_in=3, c1=8, c2=16):
    # Weights generated directly in HWIO (kH, kW, Cin, Cout).
    k1, k2, k3, k4 = jax.random.split(key, 4)
    w1 = 0.1 * jax.random.normal(k1, (3, 3, c_in, c1), dtype=jnp.float32)
    b1 = 0.1 * jax.random.normal(k2, (c1,), dtype=jnp.float32)
    w2 = 0.1 * jax.random.normal(k3, (3, 3, c1, c2), dtype=jnp.float32)
    b2 = 0.1 * jax.random.normal(k4, (c2,), dtype=jnp.float32)
    return (w1, b1), (w2, b2)


def basenet_forward(x_nchw, params):
    """BaseNet.forward: z_score -> conv/ReLU stack -> normalized activations.

    Returns a list of NCHW tensors (one per target layer), matching PyTorch.
    """
    (w1, b1), (w2, b2) = params
    B, C_IN, H, W = x_nchw.shape
    assert C_IN == 3, "BaseNet mean/std buffers imply 3 input channels"
    C1 = w1.shape[-1]
    C2 = w2.shape[-1]
    BB = _pick_images_per_step(B)

    # Lane-dense input slab: NCHW -> NHWC -> (B, H, W*C).  Wrapper-side layout
    # plumbing only; everything inside the kernel stays in this layout.
    x = jnp.transpose(x_nchw, (0, 2, 3, 1)).astype(jnp.float32)
    x2d = x.reshape(B, H, W * C_IN)

    mean_t = jnp.tile(MEAN, W).reshape(1, W * C_IN)
    inv_std_t = jnp.tile(1.0 / STD, W).reshape(1, W * C_IN)
    w1m = _conv_lane_matrices(w1.astype(jnp.float32), W)      # (3, W*Cin, W*C1)
    w2m = _conv_lane_matrices(w2.astype(jnp.float32), W)      # (3, W*C1,  W*C2)
    b1t = jnp.tile(b1.astype(jnp.float32), W).reshape(1, W * C1)
    b2t = jnp.tile(b2.astype(jnp.float32), W).reshape(1, W * C2)
    e1 = _channel_sum_matrix(W, C1)
    e2 = _channel_sum_matrix(W, C2)

    kernel = functools.partial(_fused_basenet_kernel, BB=BB, H=H, W=W,
                               C_IN=C_IN, C1=C1, C2=C2)

    o1, o2 = pl.pallas_call(
        kernel,
        out_shape=(
            jax.ShapeDtypeStruct((B, H, W * C1), jnp.float32),
            jax.ShapeDtypeStruct((B, H, W * C2), jnp.float32),
        ),
        grid_spec=pltpu.PrefetchScalarGridSpec(
            num_scalar_prefetch=0,
            grid=(B // BB,),
            in_specs=[
                pl.BlockSpec((BB, H, W * C_IN), lambda i: (i, 0, 0)),      # x
                pl.BlockSpec((1, W * C_IN), lambda i: (0, 0)),             # mean
                pl.BlockSpec((1, W * C_IN), lambda i: (0, 0)),             # 1/std
                pl.BlockSpec((3, W * C_IN, W * C1), lambda i: (0, 0, 0)),  # w1
                pl.BlockSpec((1, W * C1), lambda i: (0, 0)),               # b1
                pl.BlockSpec((W * C1, W * C1), lambda i: (0, 0)),          # e1
                pl.BlockSpec((3, W * C1, W * C2), lambda i: (0, 0, 0)),    # w2
                pl.BlockSpec((1, W * C2), lambda i: (0, 0)),               # b2
                pl.BlockSpec((W * C2, W * C2), lambda i: (0, 0)),          # e2
            ],
            out_specs=[
                pl.BlockSpec((BB, H, W * C1), lambda i: (i, 0, 0)),
                pl.BlockSpec((BB, H, W * C2), lambda i: (i, 0, 0)),
            ],
            scratch_shapes=[
                pltpu.VMEM((BB, H + 2, W * C_IN), jnp.float32),  # row-padded xz
                pltpu.VMEM((BB, H + 2, W * C1), jnp.float32),    # row-padded a1
            ],
        ),
        compiler_params=pltpu.CompilerParams(
            dimension_semantics=("parallel",),       # batch shards across TCs
            vmem_limit_bytes=_pick_vmem_limit(),
        ),
    )(x2d, mean_t, inv_std_t, w1m, b1t, e1, w2m, b2t, e2)

    # lane-dense slabs -> NHWC (free row-major reshape) -> NCHW (API glue).
    y1 = jnp.transpose(o1.reshape(B, H, W, C1), (0, 3, 1, 2))
    y2 = jnp.transpose(o2.reshape(B, H, W, C2), (0, 3, 1, 2))
    return [y1, y2]


# ------------------------ pure-JAX reference (f32) ---------------------------


def _reference_forward(x_nchw, params):
    (w1, b1), (w2, b2) = params
    x = jnp.transpose(x_nchw, (0, 2, 3, 1))
    x = (x - MEAN.reshape(1, 1, 1, 3)) / STD.reshape(1, 1, 1, 3)

    def conv(x, w, b):
        y = jax.lax.conv_general_dilated(
            x, w, window_strides=(1, 1), padding="SAME",
            dimension_numbers=("NHWC", "HWIO", "NHWC"))
        return jnp.maximum(y + b.reshape(1, 1, 1, -1), 0.0)

    def norm(x):
        n = jnp.sqrt(jnp.sum(x * x, axis=-1, keepdims=True))
        return x / (n + EPS)

    a1 = conv(x, w1, b1)
    a2 = conv(a1, w2, b2)
    return [jnp.transpose(norm(a1), (0, 3, 1, 2)),
            jnp.transpose(norm(a2), (0, 3, 1, 2))]


if __name__ == "__main__":
    key = jax.random.PRNGKey(0)
    k_x, k_p = jax.random.split(key)
    # BaseNet's mean/std buffers imply 3 input channels.
    x = jax.random.uniform(k_x, (2, 3, 16, 16), dtype=jnp.float32,
                           minval=-1.0, maxval=1.0)
    params = init_params(k_p)

    outs = basenet_forward(x, params)
    outs = jax.block_until_ready(outs)

    refs = _reference_forward(x, params)
    for o, r in zip(outs, refs):
        assert o.shape == r.shape and o.dtype == r.dtype
        assert jnp.allclose(o, r, atol=2e-4, rtol=2e-4), "mismatch vs reference"

    print("KERNEL_OK")
</pallas_src>

<mosaic_0001>
module attributes {stable_mosaic.version = 11 : i64} {
  func.func @_fused_basenet_kernel(%arg0: i32, %arg1: memref<1x16x48xf32, #tpu.memory_space<vmem>>, %arg2: memref<1x48xf32, #tpu.memory_space<vmem>>, %arg3: memref<1x48xf32, #tpu.memory_space<vmem>>, %arg4: memref<3x48x128xf32, #tpu.memory_space<vmem>>, %arg5: memref<1x128xf32, #tpu.memory_space<vmem>>, %arg6: memref<128x128xf32, #tpu.memory_space<vmem>>, %arg7: memref<3x128x256xf32, #tpu.memory_space<vmem>>, %arg8: memref<1x256xf32, #tpu.memory_space<vmem>>, %arg9: memref<256x256xf32, #tpu.memory_space<vmem>>, %arg10: memref<1x16x128xf32, #tpu.memory_space<vmem>>, %arg11: memref<1x16x256xf32, #tpu.memory_space<vmem>>, %arg12: memref<1x18x48xf32, #tpu.memory_space<vmem>>, %arg13: memref<1x18x128xf32, #tpu.memory_space<vmem>>) attributes {dimension_semantics = [#tpu.dimension_semantics<parallel>], iteration_bounds = array<i64: 2>, scalar_prefetch = 0 : i64, scratch_operands = 2 : i64, tpu.core_type = #tpu.core_type<tc>, window_params = [{transform_indices = @transform_0, window_bounds = array<i64: 1, 16, 48>}, {pipeline_mode = #tpu.pipeline_mode<synchronous>, transform_indices = @transform_1, window_bounds = array<i64: 1, 48>}, {pipeline_mode = #tpu.pipeline_mode<synchronous>, transform_indices = @transform_2, window_bounds = array<i64: 1, 48>}, {pipeline_mode = #tpu.pipeline_mode<synchronous>, transform_indices = @transform_3, window_bounds = array<i64: 3, 48, 128>}, {pipeline_mode = #tpu.pipeline_mode<synchronous>, transform_indices = @transform_4, window_bounds = array<i64: 1, 128>}, {pipeline_mode = #tpu.pipeline_mode<synchronous>, transform_indices = @transform_5, window_bounds = array<i64: 128, 128>}, {pipeline_mode = #tpu.pipeline_mode<synchronous>, transform_indices = @transform_6, window_bounds = array<i64: 3, 128, 256>}, {pipeline_mode = #tpu.pipeline_mode<synchronous>, transform_indices = @transform_7, window_bounds = array<i64: 1, 256>}, {pipeline_mode = #tpu.pipeline_mode<synchronous>, transform_indices = @transform_8, window_bounds = array<i64: 256, 256>}, {transform_indices = @transform_9, window_bounds = array<i64: 1, 16, 128>}, {transform_indices = @transform_10, window_bounds = array<i64: 1, 16, 256>}]} {
    %c0 = arith.constant 0 : index
    %c0_0 = arith.constant 0 : index
    %c0_1 = arith.constant 0 : index
    %0 = vector.load %arg1[%c0, %c0_0, %c0_1] : memref<1x16x48xf32, #tpu.memory_space<vmem>>, vector<1x16x48xf32>
    %c0_2 = arith.constant 0 : index
    %c0_3 = arith.constant 0 : index
    %1 = vector.load %arg2[%c0_2, %c0_3] : memref<1x48xf32, #tpu.memory_space<vmem>>, vector<1x48xf32>
    %2 = vector.shape_cast %1 : vector<1x48xf32> to vector<1x1x48xf32>
    %3 = vector.broadcast %2 : vector<1x1x48xf32> to vector<1x16x48xf32>
    %4 = arith.subf %0, %3 : vector<1x16x48xf32>
    %c0_4 = arith.constant 0 : index
    %c0_5 = arith.constant 0 : index
    %5 = vector.load %arg3[%c0_4, %c0_5] : memref<1x48xf32, #tpu.memory_space<vmem>>, vector<1x48xf32>
    %6 = vector.shape_cast %5 : vector<1x48xf32> to vector<1x1x48xf32>
    %7 = vector.broadcast %6 : vector<1x1x48xf32> to vector<1x16x48xf32>
    %8 = arith.mulf %4, %7 : vector<1x16x48xf32>
    %cst = arith.constant 0.000000e+00 : f32
    %9 = vector.broadcast %cst : f32 to vector<1x1x48xf32>
    %c0_6 = arith.constant 0 : index
    %c0_7 = arith.constant 0 : index
    %c0_8 = arith.constant 0 : index
    %10 = vector.load %arg12[%c0_6, %c0_7, %c0_8] : memref<1x18x48xf32, #tpu.memory_space<vmem>>, vector<1x1x48xf32>
    tpu.vector_store %arg12[%c0_6, %c0_7, %c0_8], %9 {strides = array<i32>} : memref<1x18x48xf32, #tpu.memory_space<vmem>>, vector<1x1x48xf32>,
    %c0_9 = arith.constant 0 : index
    %c17 = arith.constant 17 : index
    %c0_10 = arith.constant 0 : index
    %11 = vector.load %arg12[%c0_9, %c17, %c0_10] : memref<1x18x48xf32, #tpu.memory_space<vmem>>, vector<1x1x48xf32>
    tpu.vector_store %arg12[%c0_9, %c17, %c0_10], %9 {strides = array<i32>} : memref<1x18x48xf32, #tpu.memory_space<vmem>>, vector<1x1x48xf32>,
    %c0_11 = arith.constant 0 : index
    %c1 = arith.constant 1 : index
    %c0_12 = arith.constant 0 : index
    %12 = vector.load %arg12[%c0_11, %c1, %c0_12] : memref<1x18x48xf32, #tpu.memory_space<vmem>>, vector<1x16x48xf32>
    tpu.vector_store %arg12[%c0_11, %c1, %c0_12], %8 {strides = array<i32>} : memref<1x18x48xf32, #tpu.memory_space<vmem>>, vector<1x16x48xf32>,
    %c0_13 = arith.constant 0 : index
    %c0_14 = arith.constant 0 : index
    %c0_15 = arith.constant 0 : index
    %13 = vector.load %arg12[%c0_13, %c0_14, %c0_15] : memref<1x18x48xf32, #tpu.memory_space<vmem>>, vector<1x16x48xf32>
    %14 = vector.shape_cast %13 : vector<1x16x48xf32> to vector<16x48xf32>
    %c0_16 = arith.constant 0 : index
    %c0_17 = arith.constant 0 : index
    %c0_18 = arith.constant 0 : index
    %15 = vector.load %arg4[%c0_16, %c0_17, %c0_18] : memref<3x48x128xf32, #tpu.memory_space<vmem>>, vector<1x48x128xf32>
    %16 = vector.shape_cast %15 : vector<1x48x128xf32> to vector<48x128xf32>
    %cst_19 = arith.constant dense<0.000000e+00> : vector<16x128xf32>
    %17 = tpu.matmul %14, %16, %cst_19 {dimension_numbers = #tpu.dot_dimension_numbers<[1], [0], [0], [1], [0, 0, 1, 1], [], []>} : vector<16x48xf32>, vector<48x128xf32>, vector<16x128xf32> -> vector<16x128xf32>
    %c0_20 = arith.constant 0 : index
    %c1_21 = arith.constant 1 : index
    %c0_22 = arith.constant 0 : index
    %18 = vector.load %arg12[%c0_20, %c1_21, %c0_22] : memref<1x18x48xf32, #tpu.memory_space<vmem>>, vector<1x16x48xf32>
    %19 = vector.shape_cast %18 : vector<1x16x48xf32> to vector<16x48xf32>
    %c1_23 = arith.constant 1 : index
    %c0_24 = arith.constant 0 : index
    %c0_25 = arith.constant 0 : index
    %20 = vector.load %arg4[%c1_23, %c0_24, %c0_25] : memref<3x48x128xf32, #tpu.memory_space<vmem>>, vector<1x48x128xf32>
    %21 = vector.shape_cast %20 : vector<1x48x128xf32> to vector<48x128xf32>
    %cst_26 = arith.constant dense<0.000000e+00> : vector<16x128xf32>
    %22 = tpu.matmul %19, %21, %cst_26 {dimension_numbers = #tpu.dot_dimension_numbers<[1], [0], [0], [1], [0, 0, 1, 1], [], []>} : vector<16x48xf32>, vector<48x128xf32>, vector<16x128xf32> -> vector<16x128xf32>
    %23 = arith.addf %17, %22 : vector<16x128xf32>
    %c0_27 = arith.constant 0 : index
    %c2 = arith.constant 2 : index
    %c0_28 = arith.constant 0 : index
    %24 = vector.load %arg12[%c0_27, %c2, %c0_28] : memref<1x18x48xf32, #tpu.memory_space<vmem>>, vector<1x16x48xf32>
    %25 = vector.shape_cast %24 : vector<1x16x48xf32> to vector<16x48xf32>
    %c2_29 = arith.constant 2 : index
    %c0_30 = arith.constant 0 : index
    %c0_31 = arith.constant 0 : index
    %26 = vector.load %arg4[%c2_29, %c0_30, %c0_31] : memref<3x48x128xf32, #tpu.memory_space<vmem>>, vector<1x48x128xf32>
    %27 = vector.shape_cast %26 : vector<1x48x128xf32> to vector<48x128xf32>
    %cst_32 = arith.constant dense<0.000000e+00> : vector<16x128xf32>
    %28 = tpu.matmul %25, %27, %cst_32 {dimension_numbers = #tpu.dot_dimension_numbers<[1], [0], [0], [1], [0, 0, 1, 1], [], []>} : vector<16x48xf32>, vector<48x128xf32>, vector<16x128xf32> -> vector<16x128xf32>
    %29 = arith.addf %23, %28 : vector<16x128xf32>
    %c0_33 = arith.constant 0 : index
    %c0_34 = arith.constant 0 : index
    %30 = vector.load %arg5[%c0_33, %c0_34] : memref<1x128xf32, #tpu.memory_space<vmem>>, vector<1x128xf32>
    %31 = vector.broadcast %30 : vector<1x128xf32> to vector<16x128xf32>
    %32 = arith.addf %29, %31 : vector<16x128xf32>
    %cst_35 = arith.constant 0.000000e+00 : f32
    %33 = vector.broadcast %cst_35 : f32 to vector<16x128xf32>
    %34 = arith.maximumf %32, %33 : vector<16x128xf32>
    %35 = arith.mulf %34, %34 : vector<16x128xf32>
    %c0_36 = arith.constant 0 : index
    %c0_37 = arith.constant 0 : index
    %36 = vector.load %arg6[%c0_36, %c0_37] : memref<128x128xf32, #tpu.memory_space<vmem>>, vector<128x128xf32>
    %cst_38 = arith.constant dense<0.000000e+00> : vector<16x128xf32>
    %37 = tpu.matmul %35, %36, %cst_38 {dimension_numbers = #tpu.dot_dimension_numbers<[1], [0], [0], [1], [0, 0, 1, 1], [], []>} : vector<16x128xf32>, vector<128x128xf32>, vector<16x128xf32> -> vector<16x128xf32>
    %38 = math.sqrt %37 : vector<16x128xf32>
    %cst_39 = arith.constant 1.000000e-10 : f32
    %39 = vector.broadcast %cst_39 : f32 to vector<16x128xf32>
    %40 = arith.addf %38, %39 : vector<16x128xf32>
    %41 = tpu.reciprocal %40 : vector<16x128xf32> -> vector<16x128xf32>
    %42 = arith.mulf %34, %41 : vector<16x128xf32>
    %43 = vector.shape_cast %42 : vector<16x128xf32> to vector<1x16x128xf32>
    %c0_40 = arith.constant 0 : index
    %c0_41 = arith.constant 0 : index
    %c0_42 = arith.constant 0 : index
    %44 = vector.load %arg10[%c0_40, %c0_41, %c0_42] : memref<1x16x128xf32, #tpu.memory_space<vmem>>, vector<1x16x128xf32>
    tpu.vector_store %arg10[%c0_40, %c0_41, %c0_42], %43 {strides = array<i32>} : memref<1x16x128xf32, #tpu.memory_space<vmem>>, vector<1x16x128xf32>,
    %cst_43 = arith.constant 0.000000e+00 : f32
    %45 = vector.broadcast %cst_43 : f32 to vector<1x1x128xf32>
    %c0_44 = arith.constant 0 : index
    %c0_45 = arith.constant 0 : index
    %c0_46 = arith.constant 0 : index
    %46 = vector.load %arg13[%c0_44, %c0_45, %c0_46] : memref<1x18x128xf32, #tpu.memory_space<vmem>>, vector<1x1x128xf32>
    tpu.vector_store %arg13[%c0_44, %c0_45, %c0_46], %45 {strides = array<i32>} : memref<1x18x128xf32, #tpu.memory_space<vmem>>, vector<1x1x128xf32>,
    %c0_47 = arith.constant 0 : index
    %c17_48 = arith.constant 17 : index
    %c0_49 = arith.constant 0 : index
    %47 = vector.load %arg13[%c0_47, %c17_48, %c0_49] : memref<1x18x128xf32, #tpu.memory_space<vmem>>, vector<1x1x128xf32>
    tpu.vector_store %arg13[%c0_47, %c17_48, %c0_49], %45 {strides = array<i32>} : memref<1x18x128xf32, #tpu.memory_space<vmem>>, vector<1x1x128xf32>,
    %48 = vector.shape_cast %34 : vector<16x128xf32> to vector<1x16x128xf32>
    %c0_50 = arith.constant 0 : index
    %c1_51 = arith.constant 1 : index
    %c0_52 = arith.constant 0 : index
    %49 = vector.load %arg13[%c0_50, %c1_51, %c0_52] : memref<1x18x128xf32, #tpu.memory_space<vmem>>, vector<1x16x128xf32>
    tpu.vector_store %arg13[%c0_50, %c1_51, %c0_52], %48 {strides = array<i32>} : memref<1x18x128xf32, #tpu.memory_space<vmem>>, vector<1x16x128xf32>,
    %c0_53 = arith.constant 0 : index
    %c0_54 = arith.constant 0 : index
    %c0_55 = arith.constant 0 : index
    %50 = vector.load %arg13[%c0_53, %c0_54, %c0_55] : memref<1x18x128xf32, #tpu.memory_space<vmem>>, vector<1x16x128xf32>
    %51 = vector.shape_cast %50 : vector<1x16x128xf32> to vector<16x128xf32>
    %c0_56 = arith.constant 0 : index
    %c0_57 = arith.constant 0 : index
    %c0_58 = arith.constant 0 : index
    %52 = vector.load %arg7[%c0_56, %c0_57, %c0_58] : memref<3x128x256xf32, #tpu.memory_space<vmem>>, vector<1x128x256xf32>
    %53 = vector.shape_cast %52 : vector<1x128x256xf32> to vector<128x256xf32>
    %cst_59 = arith.constant dense<0.000000e+00> : vector<16x256xf32>
    %54 = tpu.matmul %51, %53, %cst_59 {dimension_numbers = #tpu.dot_dimension_numbers<[1], [0], [0], [1], [0, 0, 1, 1], [], []>} : vector<16x128xf32>, vector<128x256xf32>, vector<16x256xf32> -> vector<16x256xf32>
    %c0_60 = arith.constant 0 : index
    %c1_61 = arith.constant 1 : index
    %c0_62 = arith.constant 0 : index
    %55 = vector.load %arg13[%c0_60, %c1_61, %c0_62] : memref<1x18x128xf32, #tpu.memory_space<vmem>>, vector<1x16x128xf32>
    %56 = vector.shape_cast %55 : vector<1x16x128xf32> to vector<16x128xf32>
    %c1_63 = arith.constant 1 : index
    %c0_64 = arith.constant 0 : index
    %c0_65 = arith.constant 0 : index
    %57 = vector.load %arg7[%c1_63, %c0_64, %c0_65] : memref<3x128x256xf32, #tpu.memory_space<vmem>>, vector<1x128x256xf32>
    %58 = vector.shape_cast %57 : vector<1x128x256xf32> to vector<128x256xf32>
    %cst_66 = arith.constant dense<0.000000e+00> : vector<16x256xf32>
    %59 = tpu.matmul %56, %58, %cst_66 {dimension_numbers = #tpu.dot_dimension_numbers<[1], [0], [0], [1], [0, 0, 1, 1], [], []>} : vector<16x128xf32>, vector<128x256xf32>, vector<16x256xf32> -> vector<16x256xf32>
    %60 = arith.addf %54, %59 : vector<16x256xf32>
    %c0_67 = arith.constant 0 : index
    %c2_68 = arith.constant 2 : index
    %c0_69 = arith.constant 0 : index
    %61 = vector.load %arg13[%c0_67, %c2_68, %c0_69] : memref<1x18x128xf32, #tpu.memory_space<vmem>>, vector<1x16x128xf32>
    %62 = vector.shape_cast %61 : vector<1x16x128xf32> to vector<16x128xf32>
    %c2_70 = arith.constant 2 : index
    %c0_71 = arith.constant 0 : index
    %c0_72 = arith.constant 0 : index
    %63 = vector.load %arg7[%c2_70, %c0_71, %c0_72] : memref<3x128x256xf32, #tpu.memory_space<vmem>>, vector<1x128x256xf32>
    %64 = vector.shape_cast %63 : vector<1x128x256xf32> to vector<128x256xf32>
    %cst_73 = arith.constant dense<0.000000e+00> : vector<16x256xf32>
    %65 = tpu.matmul %62, %64, %cst_73 {dimension_numbers = #tpu.dot_dimension_numbers<[1], [0], [0], [1], [0, 0, 1, 1], [], []>} : vector<16x128xf32>, vector<128x256xf32>, vector<16x256xf32> -> vector<16x256xf32>
    %66 = arith.addf %60, %65 : vector<16x256xf32>
    %c0_74 = arith.constant 0 : index
    %c0_75 = arith.constant 0 : index
    %67 = vector.load %arg8[%c0_74, %c0_75] : memref<1x256xf32, #tpu.memory_space<vmem>>, vector<1x256xf32>
    %68 = vector.broadcast %67 : vector<1x256xf32> to vector<16x256xf32>
    %69 = arith.addf %66, %68 : vector<16x256xf32>
    %cst_76 = arith.constant 0.000000e+00 : f32
    %70 = vector.broadcast %cst_76 : f32 to vector<16x256xf32>
    %71 = arith.maximumf %69, %70 : vector<16x256xf32>
    %72 = arith.mulf %71, %71 : vector<16x256xf32>
    %c0_77 = arith.constant 0 : index
    %c0_78 = arith.constant 0 : index
    %73 = vector.load %arg9[%c0_77, %c0_78] : memref<256x256xf32, #tpu.memory_space<vmem>>, vector<256x256xf32>
    %cst_79 = arith.constant dense<0.000000e+00> : vector<16x256xf32>
    %74 = tpu.matmul %72, %73, %cst_79 {dimension_numbers = #tpu.dot_dimension_numbers<[1], [0], [0], [1], [0, 0, 1, 1], [], []>} : vector<16x256xf32>, vector<256x256xf32>, vector<16x256xf32> -> vector<16x256xf32>
    %75 = math.sqrt %74 : vector<16x256xf32>
    %cst_80 = arith.constant 1.000000e-10 : f32
    %76 = vector.broadcast %cst_80 : f32 to vector<16x256xf32>
    %77 = arith.addf %75, %76 : vector<16x256xf32>
    %78 = tpu.reciprocal %77 : vector<16x256xf32> -> vector<16x256xf32>
    %79 = arith.mulf %71, %78 : vector<16x256xf32>
    %80 = vector.shape_cast %79 : vector<16x256xf32> to vector<1x16x256xf32>
    %c0_81 = arith.constant 0 : index
    %c0_82 = arith.constant 0 : index
    %c0_83 = arith.constant 0 : index
    %81 = vector.load %arg11[%c0_81, %c0_82, %c0_83] : memref<1x16x256xf32, #tpu.memory_space<vmem>>, vector<1x16x256xf32>
    tpu.vector_store %arg11[%c0_81, %c0_82, %c0_83], %80 {strides = array<i32>} : memref<1x16x256xf32, #tpu.memory_space<vmem>>, vector<1x16x256xf32>,
    return
  }
  func.func @transform_0(%arg0: i32) -> (i32, i32, i32) {
    %c0_i32 = arith.constant 0 : i32
    %c0_i32_0 = arith.constant 0 : i32
    %c0_i32_1 = arith.constant 0 : i32
    return %arg0, %c0_i32, %c0_i32_0 : i32, i32, i32
  }
  func.func @transform_1(%arg0: i32) -> (i32, i32) {
    %c0_i32 = arith.constant 0 : i32
    %c0_i32_0 = arith.constant 0 : i32
    %c0_i32_1 = arith.constant 0 : i32
    return %c0_i32, %c0_i32_0 : i32, i32
  }
  func.func @transform_2(%arg0: i32) -> (i32, i32) {
    %c0_i32 = arith.constant 0 : i32
    %c0_i32_0 = arith.constant 0 : i32
    %c0_i32_1 = arith.constant 0 : i32
    return %c0_i32, %c0_i32_0 : i32, i32
  }
  func.func @transform_3(%arg0: i32) -> (i32, i32, i32) {
    %c0_i32 = arith.constant 0 : i32
    %c0_i32_0 = arith.constant 0 : i32
    %c0_i32_1 = arith.constant 0 : i32
    %c0_i32_2 = arith.constant 0 : i32
    return %c0_i32, %c0_i32_0, %c0_i32_1 : i32, i32, i32
  }
  func.func @transform_4(%arg0: i32) -> (i32, i32) {
    %c0_i32 = arith.constant 0 : i32
    %c0_i32_0 = arith.constant 0 : i32
    %c0_i32_1 = arith.constant 0 : i32
    return %c0_i32, %c0_i32_0 : i32, i32
  }
  func.func @transform_5(%arg0: i32) -> (i32, i32) {
    %c0_i32 = arith.constant 0 : i32
    %c0_i32_0 = arith.constant 0 : i32
    %c0_i32_1 = arith.constant 0 : i32
    return %c0_i32, %c0_i32_0 : i32, i32
  }
  func.func @transform_6(%arg0: i32) -> (i32, i32, i32) {
    %c0_i32 = arith.constant 0 : i32
    %c0_i32_0 = arith.constant 0 : i32
    %c0_i32_1 = arith.constant 0 : i32
    %c0_i32_2 = arith.constant 0 : i32
    return %c0_i32, %c0_i32_0, %c0_i32_1 : i32, i32, i32
  }
  func.func @transform_7(%arg0: i32) -> (i32, i32) {
    %c0_i32 = arith.constant 0 : i32
    %c0_i32_0 = arith.constant 0 : i32
    %c0_i32_1 = arith.constant 0 : i32
    return %c0_i32, %c0_i32_0 : i32, i32
  }
  func.func @transform_8(%arg0: i32) -> (i32, i32) {
    %c0_i32 = arith.constant 0 : i32
    %c0_i32_0 = arith.constant 0 : i32
    %c0_i32_1 = arith.constant 0 : i32
    return %c0_i32, %c0_i32_0 : i32, i32
  }
  func.func @transform_9(%arg0: i32) -> (i32, i32, i32) {
    %c0_i32 = arith.constant 0 : i32
    %c0_i32_0 = arith.constant 0 : i32
    %c0_i32_1 = arith.constant 0 : i32
    return %arg0, %c0_i32, %c0_i32_0 : i32, i32, i32
  }
  func.func @transform_10(%arg0: i32) -> (i32, i32, i32) {
    %c0_i32 = arith.constant 0 : i32
    %c0_i32_0 = arith.constant 0 : i32
    %c0_i32_1 = arith.constant 0 : i32
    return %arg0, %c0_i32, %c0_i32_0 : i32, i32, i32
  }
}

</mosaic_0001>

<bundles_post_ra>
// kernel: tpu_custom_call.1
= control target key start
LH: loop header
LB: loop body
LE: loop exit
PB: predicated region body
PF: predicated region fallthrough
CT: control target
= control target key end

     0   :  { %s2848_s0 = inlined_call_operand.hbm [shape: f32[2,16,48], index: 0, kind: input, shape index: {}]   ;;  %s2849_s1 = inlined_call_operand.vmem [shape: f32[1,48], index: 1, kind: input, shape index: {}]   ;;  %s2850_s2 = inlined_call_operand.vmem [shape: f32[1,48], index: 2, kind: input, shape index: {}]   ;;  %s2851_s3 = inlined_call_operand.hbm [shape: f32[3,48,128], index: 3, kind: input, shape index: {}]   ;;  %s2852_s4 = inlined_call_operand.vmem [shape: f32[1,128], index: 4, kind: input, shape index: {}]   ;;  %s2853_s5 = inlined_call_operand.hbm [shape: f32[128,128], index: 5, kind: input, shape index: {}]   ;;  %s2854_s6 = inlined_call_operand.hbm [shape: f32[3,128,256], index: 6, kind: input, shape index: {}]   ;;  %s2855_s7 = inlined_call_operand.vmem [shape: f32[1,256], index: 7, kind: input, shape index: {}]   ;;  %s2856_s8 = inlined_call_operand.hbm [shape: f32[256,256], index: 8, kind: input, shape index: {}]   ;;  %s2857_s9 = inlined_call_operand.hbm [shape: f32[2,16,128], index: 9, kind: output, shape index: {0}]   ;;  %s2858_s10 = inlined_call_operand.hbm [shape: f32[2,16,256], index: 10, kind: output, shape index: {1}]  }
   0x1   :  { %2870 = sst [smem:[#allocation23_spill]] %s2851_s3 }
   0x2   :  { %2871 = sst [smem:[#allocation24_spill]] %s2858_s10 }
   0x3   :  { %16 = vsyncpa [#allocation5], 0 }
   0x4   :  { %18 = vsyncpa [#allocation5 + $0x1], 0 }
   0x5   :  { %19 = vsyncpa [#allocation8], 0 }
   0x6   :  { %20 = vsyncpa [#allocation11], 0 }
   0x7   :  { %21 = vsyncpa [#allocation6], 0 }
   0x8   :  { %23 = vsyncpa [#allocation6 + $0x1], 0 }
   0x9   :  { %24 = vsyncpa [#allocation15], 0 }
   0xa   :  { %26 = vsyncpa [#allocation15 + $0x1], 0  ;;  %s2446_s13 = smov 0   ;;  %s2448_s14 = smov 0  }
   0xb   :  { %s2450_s15 = smov 0   ;;  %s2452_s16 = smov 0  }
   0xc LB: > { %2872 = sst [smem:[#allocation21_spill]] %s2361_s13  ;;  %s2467_s17 = sadd.s32 4294967295, %s2373_s16   ;;  %s2373_s16 = sphi %s2452_s16, %s2900_s16   ;;  %s2369_s15 = sphi %s2450_s15, %s2899_s15   ;;  %s2365_s14 = sphi %s2448_s14, %s2898_s14   ;;  %s2361_s13 = sphi %s2446_s13, %s2897_s13  }
   0xd   : > { %s1600_s18 = sadd.s32 4294967294, %s2373_s16   ;;  %p52_p0 = scmp.ne.s32.totalorder %s2365_s14, %s2361_s13 }
   0xe   : > { %p2859_p1 = scmp.eq.s32.totalorder %s2467_s17, 0  ;;  %p250_p3 = scmp.eq.s32.totalorder %s1600_s18, 1 }
   0xf   : > { %p1601_p5 = scmp.ge.s32.totalorder %s2373_s16, 1  ;;  %p283_p7 = scmp.lt.s32.totalorder %s2373_s16, 3 }
  0x10   : > { %p2476_p4 = por %p2859_p1, %p52_p0  ;;  %p2481_p6 = por %p250_p3, %p52_p0 }
  0x11   : > { %p2486_p8 = pnand %p1601_p5, %p283_p7  ;;  %s2375_s22 = smov [#allocation7]  }
  0x12   : > { %s2873_s19 = scalar_select %p2476_p4, 1, 0 }
  0x13   : > { %s2874_s20 = scalar_select %p2481_p6, 1, 0 }
  0x14   : > { %s2876_s21 = scalar_select %p2486_p8, 1, 0 }
  0x15   : > { %2875 = sst [smem:[#allocation22_spill]] %s2874_s20  ;;  %s301_s23 = sshll.u32 %s2375_s22, 4  ;;  %s2490_s23 = int_to_ptr.vmem [resolvable:$true] %s301_s23 }
  0x16   : > { %p2022_p9 = pneg %p2486_p8  ;;  %s2376_s25 = smov [#allocation10]  }
  0x17   : > { %s330_s26 = sshll.u32 %s2376_s25, 4  ;;  %s2878_s3 = sld [smem:[#allocation23_spill]]  ;;  %s2501_s26 = int_to_ptr.vmem [resolvable:$true] %s330_s26 }
  0x18   : > { %p2497_p11 = pnand %p2022_p9, %p2859_p1 }
  0x1a   : > { %p2511_p13 = pneg %p2497_p11 }
  0x1d   : > { %s2125_s29 = scalar_lea.hbm %s2878_s3, 2304 }
  0x1e   : > { %p2126_p12 = scmp.ne.s32.totalorder %s2878_s3, %s2125_s29  ;;  %p2132_p5 = scmp.lt.u32.totalorder %s2125_s29, %s2878_s3 }
  0x20   : > { %p2128_p0 = pnand %p2511_p13, %p2126_p12 }
  0x22   : > { %p2129_p3 = pneg %p2128_p0 }
  0x24   : > { %p2134_p7 = pnand %p2132_p5, %p2129_p3 }
  0x26   : > { %2137 = shalt.err (!%p2134_p7)
}
  0x27   : > { %s2138_s25 = scalar_lea.vmem %s2490_s23, 2304  ;;  %p2146_p2 = scmp.lt.s32.totalorder %s2490_s23, %s2490_s23 }
  0x28   : > { %p2139_p9 = scmp.ne.s32.totalorder %s2490_s23, %s2138_s25  ;;  %p2147_p6 = scmp.lt.s32.totalorder %s2138_s25, %s2138_s25 }
  0x2a   : > { %p2141_p10 = pnand %p2139_p9, %p2511_p13  ;;  %p2148_p12 = por %p2147_p6, %p2146_p2 }
  0x2c   : > { %p2142_p1 = pneg %p2141_p10 }
  0x2e   : > { %p2149_p0 = pnand %p2148_p12, %p2142_p1 }
  0x30   : > { %2152 = shalt.err (!%p2149_p0)
}
  0x31   : > { %s2863_s27 = smov 128   ;;  %s2865_s28 = smov 8  }
  0x32   : > { %2025 = dma.hbm_to_vmem [thread:$0]  (!%p2497_p11), %s2878_s3, 2304, %s2490_s23, [#allocation8], %s2863_s27, %s2863_s27, %s2865_s28  }
  0x33   : > { %s2153_s22 = scalar_lea.hbm %s2854_s6, 12288 }
  0x34   : > { %p2154_p1 = scmp.ne.s32.totalorder %s2854_s6, %s2153_s22  ;;  %p2160_p10 = scmp.lt.u32.totalorder %s2153_s22, %s2854_s6 }
  0x36   : > { %p2156_p2 = pnand %p2154_p1, %p2511_p13 }
  0x38   : > { %p2157_p6 = pneg %p2156_p2 }
  0x3a   : > { %p2162_p3 = pnand %p2160_p10, %p2157_p6 }
  0x3c   : > { %2165 = shalt.err (!%p2162_p3)
}
  0x3d   : > { %s2166_s23 = scalar_lea.vmem %s2501_s26, 12288  ;;  %p2174_p12 = scmp.lt.s32.totalorder %s2501_s26, %s2501_s26 }
  0x3e   : > { %p2167_p5 = scmp.ne.s32.totalorder %s2501_s26, %s2166_s23  ;;  %p2175_p0 = scmp.lt.s32.totalorder %s2166_s23, %s2166_s23 }
  0x40   : > { %p2169_p7 = pnand %p2167_p5, %p2511_p13  ;;  %p2176_p1 = por %p2175_p0, %p2174_p12 }
  0x42   : > { %p2170_p9 = pneg %p2169_p7 }
  0x44   : > { %p2177_p2 = pnand %p2176_p1, %p2170_p9 }
  0x46   : > { %2180 = shalt.err (!%p2177_p2)
}
  0x47   : > { %s2869_s20 = smov 256   ;;  %s2380_s10 = smov 16  }
  0x48   : > { %2031 = dma.hbm_to_vmem [thread:$0]  (!%p2497_p11), %s2854_s6, 12288, %s2501_s26, [#allocation11], %s2869_s20, %s2869_s20, %s2380_s10  }
  0x49   : > { %s2381_s30 = smov [#allocation9]   ;;  %s2382_s18 = smov [#allocation12]  }
  0x4a   : > { %s317_s11 = sshll.u32 %s2381_s30, 4  ;;  %s346_s22 = sshll.u32 %s2382_s18, 4  ;;  %s318_s11 = int_to_ptr.vmem [resolvable:$true] %s317_s11  ;;  %s2561_s22 = int_to_ptr.vmem [resolvable:$true] %s346_s22 }
  0x4b   : > { %s2181_s27 = scalar_lea.hbm %s2853_s5, 2048 }
  0x4c   : > { %p2182_p6 = scmp.ne.s32.totalorder %s2853_s5, %s2181_s27  ;;  %p2188_p5 = scmp.lt.u32.totalorder %s2181_s27, %s2853_s5 }
  0x4e   : > { %p2184_p10 = pnand %p2182_p6, %p2511_p13 }
  0x50   : > { %p2185_p3 = pneg %p2184_p10 }
  0x52   : > { %p2190_p7 = pnand %p2188_p5, %p2185_p3 }
  0x54   : > { %2193 = shalt.err (!%p2190_p7)
}
  0x55   : > { %s2194_s29 = scalar_lea.vmem %s318_s11, 2048  ;;  %p2202_p1 = scmp.lt.s32.totalorder %s318_s11, %s318_s11 }
  0x56   : > { %p2195_p9 = scmp.ne.s32.totalorder %s318_s11, %s2194_s29  ;;  %p2203_p2 = scmp.lt.s32.totalorder %s2194_s29, %s2194_s29 }
  0x58   : > { %p2197_p12 = pnand %p2195_p9, %p2511_p13  ;;  %p2204_p4 = por %p2203_p2, %p2202_p1 }
  0x5a   : > { %p2198_p0 = pneg %p2197_p12 }
  0x5c   : > { %p2205_p8 = pnand %p2204_p4, %p2198_p0 }
  0x5e   : > { %2208 = shalt.err (!%p2205_p8)
}
  0x5f   : > { %s2880_s3 = smov 8   ;;  %s2881_s28 = smov 128  }
  0x60   : > { %2028 = dma.hbm_to_vmem [thread:$0]  (!%p2497_p11), %s2853_s5, 2048, %s318_s11, [#allocation8], %s2881_s28, %s2881_s28, %s2880_s3  }
  0x61   : > { %s2209_s23 = scalar_lea.hbm %s2856_s8, 8192 }
  0x62   : > { %p2210_p6 = scmp.ne.s32.totalorder %s2856_s8, %s2209_s23  ;;  %p2216_p10 = scmp.lt.u32.totalorder %s2209_s23, %s2856_s8 }
  0x64   : > { %p2212_p4 = pnand %p2210_p6, %p2511_p13 }
  0x66   : > { %p2213_p8 = pneg %p2212_p4 }
  0x68   : > { %p2218_p3 = pnand %p2216_p10, %p2213_p8 }
  0x6a   : > { %2221 = shalt.err (!%p2218_p3)
}
  0x6b   : > { %s2222_s11 = scalar_lea.vmem %s2561_s22, 8192  ;;  %p2230_p12 = scmp.lt.s32.totalorder %s2561_s22, %s2561_s22 }
  0x6c   : > { %p2223_p5 = scmp.ne.s32.totalorder %s2561_s22, %s2222_s11  ;;  %p2231_p0 = scmp.lt.s32.totalorder %s2222_s11, %s2222_s11 }
  0x6e   : > { %p2225_p7 = pnand %p2223_p5, %p2511_p13  ;;  %p2232_p1 = por %p2231_p0, %p2230_p12 }
  0x70   : > { %p2226_p9 = pneg %p2225_p7 }
  0x72   : > { %p2233_p2 = pnand %p2232_p1, %p2226_p9 }
  0x74   : > { %2236 = shalt.err (!%p2233_p2)
}
  0x75   : > { %s2882_s20 = smov 256   ;;  %s2611_s24 = sadd.s32 1, %s2373_s16  }
  0x76   : > { %2034 = dma.hbm_to_vmem [thread:$0]  (!%p2497_p11), %s2856_s8, 8192, %s2561_s22, [#allocation11], %s2882_s20, %s2882_s20, %s2380_s10  }
  0x77   : > { %s36_s12 = ssub.s32 %s2373_s16, %s2611_s24  ;;  %s39_s18 = sadd.s32 1, %s2369_s15 }
  0x78   : > { %p37_p13 = scmp.eq.s32.totalorder %s36_s12, 0  ;;  %p46_p6 = scmp.ne.s32.totalorder %s2369_s15, %s2365_s14 }
  0x79   : > { %p47_p4 = scmp.eq.s32.totalorder %s2373_s16, 0  ;;  %p2883_p10 = scmp.eq.s32.totalorder %s2467_s17, 1 }
  0x7a   : > { %s2620_s25 = scalar_select %p37_p13, %s2369_s15, %s39_s18  }
  0x7b   : > { %p48_p8 = por %p47_p4, %p46_p6  ;;  %p2624_p3 = por %p2883_p10, %p46_p6 }
  0x7c   : > { %p2050_p5 = scmp.lt.s32.totalorder %s2373_s16, 2  ;;  %s360_s13 = sand.u32 1, %s2369_s15  }
  0x7d   : > { %s1607_s26 = sshll.u32 %s360_s13, 4  ;;  %s1635_s10 = sshll.u32 %s2373_s16, 8 }
  0x7e   : > { %s2634_s11 = scalar_lea.hbm %s2848_s0, %s1635_s10  ;;  %s364_s20 = scalar_lea.vmem [#allocation4], %s1607_s26 }
  0x7f   : > { %s371_s30 = sshll.u32 %s364_s20, 4  ;;  %p2638_p11 = pnand %p2050_p5, %p48_p8  ;;  %s2636_s30 = int_to_ptr.vmem [resolvable:$true] %s371_s30 }
  0x80   : > { %s2642_s12 = scalar_lea.sflag [#allocation5], %s360_s13  ;;  %s2237_s18 = scalar_lea.hbm %s2634_s11, 256 }
  0x81   : > { %p2238_p7 = scmp.ne.s32.totalorder %s2634_s11, %s2237_s18  ;;  %p2239_p9 = pneg %p2638_p11 }
  0x82   : > { %s2242_s22 = scalar_lea.hbm %s2848_s0, 512  ;;  %p2243_p1 = scmp.lt.u32.totalorder %s2634_s11, %s2848_s0 }
  0x83   : > { %p2240_p12 = pnand %p2239_p9, %p2238_p7  ;;  %p2244_p2 = scmp.lt.u32.totalorder %s2242_s22, %s2237_s18 }
  0x84   : > { %p2246_p6 = scmp.lt.u32.totalorder %s2237_s18, %s2634_s11 }
  0x85   : > { %p2241_p0 = pneg %p2240_p12  ;;  %p2245_p13 = por %p2244_p2, %p2243_p1 }
  0x87   : > { %p2247_p4 = por %p2246_p6, %p2245_p13 }
  0x89   : > { %p2248_p8 = pnand %p2247_p4, %p2241_p0 }
  0x8b   : > { %2251 = shalt.err (!%p2248_p8)
}
  0x8c   : > { %s2252_s13 = scalar_lea.vmem %s2636_s30, 256  ;;  %s2383_s26 = smov [#allocation4]  }
  0x8d   : > { %p2253_p10 = scmp.ne.s32.totalorder %s2636_s30, %s2252_s13  ;;  %s2257_s10 = sshll.u32 %s2383_s26, 4  ;;  %s2258_s10 = int_to_ptr.vmem [resolvable:$false] %s2257_s10 }
  0x8e   : > { %s2259_s29 = scalar_lea.vmem %s2258_s10, 512  ;;  %p2260_p12 = scmp.lt.s32.totalorder %s2636_s30, %s2258_s10 }
  0x8f   : > { %p2255_p5 = pnand %p2253_p10, %p2239_p9  ;;  %p2261_p1 = scmp.lt.s32.totalorder %s2259_s29, %s2252_s13 }
  0x91   : > { %p2256_p7 = pneg %p2255_p5  ;;  %p2262_p2 = por %p2261_p1, %p2260_p12 }
  0x93   : > { %p2263_p13 = pnand %p2262_p2, %p2256_p7 }
  0x95   : > { %2266 = shalt.err (!%p2263_p13)
}
  0x96   : > { %2038 = dma.hbm_to_vmem [thread:$0]  (!%p2638_p11), %s2634_s11, 256, %s2636_s30, %s2642_s12, %s2881_s28, %s2881_s28, %s2880_s3  }
  0x97   : > { %p2886_p9 = scmp.ne.s32.totalorder %s2876_s21, 0 }
  0x98   : > { %s2676_s18 = sand.u32 (!%p2886_p9), 1, %s2365_s14   ;;  %p2887_p0 = scmp.ne.s32.totalorder (!%p2886_p9), %s2873_s19, 0 }
  0x99   : > { %383 = sbr.rel (%p2886_p9) target bundleno = 1007 (0x3ef), region = 56  ;;  %s1611_s22 = sshll.u32 (!%p2886_p9), %s2676_s18, 4 }
  0x9a   : > { %s386_s20 = scalar_lea.sflag (!%p2886_p9), [#allocation5], %s2676_s18  ;;  %s389_s27 = scalar_lea.vmem (!%p2886_p9), [#allocation4], %s1611_s22 }
  0xa0   : > { %2340 = dma.done.wait (%p2887_p0), %s386_s20, 256  }
  0xa1   : > { %2342 = vsyncadd (%p2887_p0), %s386_s20, 4294967040  ;;  %p2888_p11 = scmp.eq.s32.totalorder %s2467_s17, 0 }
  0xa3   : > { %2344 = dma.done.wait (%p2888_p11), [#allocation8], 4352   ;;  %p2889_p6 = pmov %p2888_p11 }
  0xa5   : > { %2346 = vsyncadd (%p2889_p6), [#allocation8], 4294962944  ;;  %p2890_p4 = pmov %p2889_p6 }
  0xa7   : > { %2348 = dma.done.wait (%p2890_p4), [#allocation11], 20480   ;;  %p2891_p8 = pmov %p2890_p4 }
  0xa8   : > { %vm467_vm0 = vcmask 385024   ;;  %v2384_v0 = vmov 0.0   ;;  %v484_v1 = vld [vmem:[#allocation7 + $0x30] sm:$0xff]  ;;  %v485_v2 = vld [vmem:[#allocation7 + $0x38] sm:$0xff]  ;;  %v486_v3 = vld [vmem:[#allocation7 + $0x40] sm:$0xff]  ;;  %vm470_vm1 = vcmask 392192  }
  0xa9   : > { %2350 = vsyncadd (%p2891_p8), [#allocation11], 4294946816  ;;  %468 = vst.msk [vmem:[#allocation2] sm:$0x1] %vm467_vm0, %v2384_v0  ;;  %v1760_v4 = vpack.c.bf16 %v485_v2, %v484_v1  ;;  %v487_v5 = vld [vmem:[#allocation7 + $0x48] sm:$0xff]  ;;  %v488_v6 = vld [vmem:[#allocation7 + $0x50] sm:$0xff] }
  0xaa   : > { %469 = vst.msk [vmem:[#allocation2 + $0x11] sm:$0x1] %vm467_vm0, %v2384_v0  ;;  %870 = vst [vmem:[#allocation3] sm:$0x1] %v2384_v0  ;;  %v489_v7 = vld [vmem:[#allocation7 + $0x58] sm:$0xff]  ;;  %v1764_v8 = vpack.c.bf16 %v487_v5, %v486_v3  ;;  %v447_v9 = vld [vmem:[%s389_s27] sm:$0xff] }
  0xab   : > { %871 = vst [vmem:[#allocation3 + $0x11] sm:$0x1] %v2384_v0  ;;  %v448_v10 = vld [vmem:[%s389_s27 + $0x8] sm:$0xff]  ;;  %v1618_v11 = vld [vmem:[%s2849_s1] ss:$0 sm:$0xff]  ;;  %1761 = vmatprep.subr.bf16.mxu0 %v1760_v4  ;;  %v1768_v15 = vpack.c.bf16 %v489_v7, %v488_v6  ;;  %v475_v18 = vld [vmem:[#allocation7] sm:$0xff] }
  0xac   : > { %v456_v12 = vsub.f32 %v447_v9, %v1618_v11  ;;  %v457_v13 = vsub.f32 %v448_v10, %v1618_v11  ;;  %v1619_v14 = vld [vmem:[%s2850_s2] ss:$0 sm:$0xff]  ;;  %1763 = vmatpush3.bf16.msra.mxu0 %v1760_v4  ;;  %v476_v19 = vld [vmem:[#allocation7 + $0x8] sm:$0xff]  ;;  %v758_v21 = vld [vmem:[#allocation9 + $0x8] sm:$0xff]  ;;  %s2737_s12 = scalar_lea.vmem [#allocation13], %s1611_s22  ;;  %s1636_s10 = sshll.u32 %s2467_s17, 8 }
  0xad   : > { %1765 = vmatprep.subr.bf16.mxu0 %v1764_v8  ;;  %v757_v20 = vld [vmem:[#allocation9] sm:$0xff]  ;;  %v759_v23 = vld [vmem:[#allocation9 + $0x10] sm:$0xff]  ;;  %v760_v24 = vld [vmem:[#allocation9 + $0x18] sm:$0xff]  ;;  %v1772_v25 = vpack.c.bf16 %v476_v19, %v475_v18  ;;  %s2764_s20 = scalar_lea.hbm %s2857_s9, %s1636_s10  ;;  %s1441_s27 = sshll.u32 %s2737_s12, 4  ;;  %s2767_s27 = int_to_ptr.vmem [resolvable:$true] %s1441_s27 }
  0xae   : > { %v465_v16 = vmul.f32 %v1619_v14, %v456_v12  ;;  %v466_v17 = vmul.f32 %v1619_v14, %v457_v13  ;;  %v1796_v22 = vpack.c.bf16 %v758_v21, %v757_v20  ;;  %v1800_v26 = vpack.c.bf16 %v760_v24, %v759_v23  ;;  %v761_v27 = vld [vmem:[#allocation9 + $0x20] sm:$0xff]  ;;  %v762_v28 = vld [vmem:[#allocation9 + $0x28] sm:$0xff]  ;;  %v763_v32 = vld [vmem:[#allocation9 + $0x30] sm:$0xff]  ;;  %s1423_s19 = scalar_lea.sflag [#allocation6], %s2676_s18  ;;  %s2267_s21 = scalar_lea.vmem %s2767_s27, 256 }
  0xaf   : > { %v477_v29 = vld [vmem:[#allocation7 + $0x10] sm:$0xff]  ;;  %v478_v30 = vld [vmem:[#allocation7 + $0x18] sm:$0xff]  ;;  %v1804_v31 = vpack.c.bf16 %v762_v28, %v761_v27  ;;  %v764_v33 = vld [vmem:[#allocation9 + $0x38] sm:$0xff]  ;;  %p2268_p10 = scmp.ne.s32.totalorder %s2767_s27, %s2267_s21  ;;  %s2385_s3 = smov [#allocation13]  }
  0xb0   : > { %471 = vst.msk [vmem:[#allocation2 + $0x1] sm:$0xff] %vm470_vm1, %v465_v16  ;;  %472 = vst.msk [vmem:[#allocation2 + $0x9] sm:$0xff] %vm470_vm1, %v466_v17  ;;  %1767 = vmatpush3.bf16.msra.mxu0 %v1764_v8  ;;  %1797 = vmatprep.subr.bf16.mxu1 %v1796_v22  ;;  %v1776_v36 = vpack.c.bf16 %v478_v30, %v477_v29  ;;  %v479_v38 = vld [vmem:[#allocation7 + $0x20] sm:$0xff]  ;;  %v480_v39 = vld [vmem:[#allocation7 + $0x28] sm:$0xff]  ;;  %v1808_v40 = vpack.c.bf16 %v764_v33, %v763_v32  ;;  %s2271_s28 = sshll.u32 %s2385_s3, 4  ;;  %s2272_s28 = int_to_ptr.vmem [resolvable:$false] %s2271_s28 }
  0xb1   : > { %1769 = vmatprep.subr.bf16.mxu0 %v1768_v15  ;;  %1799 = vmatpush3.bf16.msra.mxu1 %v1796_v22  ;;  %v765_v41 = vld [vmem:[#allocation9 + $0x40] sm:$0xff]  ;;  %v766_v42 = vld [vmem:[#allocation9 + $0x48] sm:$0xff]  ;;  %v1780_v43 = vpack.c.bf16 %v480_v39, %v479_v38  ;;  %v655_v44 = vld [vmem:[#allocation7 + $0x60] sm:$0xff]  ;;  %p2269_p5 = pnand %p2268_p10, %p2624_p3  ;;  %s2273_s11 = scalar_lea.vmem %s2272_s28, 512 }
  0xb2   : > { %1801 = vmatprep.subr.bf16.mxu1 %v1800_v26  ;;  %v656_v45 = vld [vmem:[#allocation7 + $0x68] sm:$0xff]  ;;  %v1812_v46 = vpack.c.bf16 %v766_v42, %v765_v41  ;;  %v767_v47 = vld [vmem:[#allocation9 + $0x50] sm:$0xff]  ;;  %v657_v50 = vld [vmem:[#allocation7 + $0x70] sm:$0xff]  ;;  %p2274_p12 = scmp.lt.s32.totalorder %s2767_s27, %s2272_s28  ;;  %p2275_p1 = scmp.lt.s32.totalorder %s2273_s11, %s2267_s21 }
  0xb3   : > { %v768_v48 = vld [vmem:[#allocation9 + $0x58] sm:$0xff]  ;;  %v1784_v49 = vpack.c.bf16 %v656_v45, %v655_v44  ;;  %v658_v51 = vld [vmem:[#allocation7 + $0x78] sm:$0xff]  ;;  %v659_v56 = vld [vmem:[#allocation7 + $0x80] sm:$0xff]  ;;  %p2270_p7 = pneg %p2269_p5 }
  0xb4   : > { %1771 = vmatpush3.bf16.msra.mxu0 %v1768_v15  ;;  %v1816_v52 = vpack.c.bf16 %v768_v48, %v767_v47  ;;  %v1788_v54 = vpack.c.bf16 %v658_v51, %v657_v50  ;;  %v660_v57 = vld [vmem:[#allocation7 + $0x88] sm:$0xff]  ;;  %v769_v60 = vld [vmem:[#allocation9 + $0x60] sm:$0xff]  ;;  %v770_v61 = vld [vmem:[#allocation9 + $0x68] sm:$0xff]  ;;  %p2276_p2 = por %p2275_p1, %p2274_p12 }
  0xb5   : > { %1773 = vmatprep.subr.bf16.mxu0 %v1772_v25  ;;  %1803 = vmatpush3.bf16.msra.mxu1 %v1800_v26  ;;  %v1792_v58 = vpack.c.bf16 %v660_v57, %v659_v56  ;;  %v1820_v62 = vpack.c.bf16 %v770_v61, %v769_v60  ;;  %v771_v63 = vld [vmem:[#allocation9 + $0x70] sm:$0xff]  ;;  %v772_v1 = vld [vmem:[#allocation9 + $0x78] sm:$0xff]  ;;  %v912_v3 = vld [vmem:[#allocation10 + $0x108] sm:$0xff] }
  0xb6   : > { %1805 = vmatprep.subr.bf16.mxu1 %v1804_v31  ;;  %v1824_v2 = vpack.c.bf16 %v772_v1, %v771_v63  ;;  %v914_v4 = vld [vmem:[#allocation10 + $0x118] sm:$0xff]  ;;  %v1626_v6 = vld [vmem:[%s2852_s4] ss:$0 sm:$0xff]  ;;  %v913_v13 = vld [vmem:[#allocation10 + $0x110] sm:$0xff]  ;;  %p2277_p13 = pnand %p2276_p2, %p2270_p7 }
  0xb7   : > { %v481_v34 = vld [vmem:[#allocation2 + $0x1] sm:$0xff]  ;;  %v482_v35 = vld [vmem:[#allocation2 + $0x9] sm:$0xff]  ;;  %v1828_v5 = vpack.c.bf16 %v914_v4, %v912_v3  ;;  %v918_v16 = vld [vmem:[#allocation10 + $0x138] sm:$0xff] }
  0xb8   : > { %v473_v37 = vld [vmem:[#allocation2] sm:$0xff]  ;;  %1692 = vmatprep.mubr.msk.f32.mxu0 %vm470_vm1, %v481_v34  ;;  %v474_v53 = vld [vmem:[#allocation2 + $0x8] sm:$0xff]  ;;  %v917_v22 = vld [vmem:[#allocation10 + $0x130] sm:$0xff] }
  0xb9   : > { %1693 = vmatmul.mubr.msk.f32.vlgmr.msra.gmra.mrb[0].mxu0 %vm470_vm1, %v482_v35  ;;  %1807 = vmatpush3.bf16.msra.mxu1 %v1804_v31  ;;  %v652_v55 = vld [vmem:[#allocation2 + $0x2] sm:$0xff]  ;;  %v653_v59 = vld [vmem:[#allocation2 + $0xa] sm:$0xff]  ;;  %v922_v24 = vld [vmem:[#allocation10 + $0x158] sm:$0xff] }
  0xba   : > { %1775 = vmatpush3.bf16.msra.mxu0 %v1772_v25  ;;  %1707 = vmatprep.mubr.msk.f32.mxu0 %vm470_vm1, %v473_v37  ;;  %v911_v12 = vld [vmem:[#allocation10 + $0x100] sm:$0xff]  ;;  %v916_v15 = vld [vmem:[#allocation10 + $0x128] sm:$0xff]  ;;  %v921_v28 = vld [vmem:[#allocation10 + $0x150] sm:$0xff] }
  0xbb   : > { %1777 = vmatprep.subr.bf16.mxu0 %v1776_v36  ;;  %1809 = vmatprep.subr.bf16.mxu1 %v1808_v40  ;;  %v1830_v18 = vpack.c.bf16 %v913_v13, %v911_v12  ;;  %v1832_v20 = vpack.c.bf16 %v918_v16, %v916_v15  ;;  %v915_v21 = vld [vmem:[#allocation10 + $0x120] sm:$0xff]  ;;  %v920_v23 = vld [vmem:[#allocation10 + $0x148] sm:$0xff]  ;;  %v926_v30 = vld [vmem:[#allocation10 + $0x178] sm:$0xff] }
  0xbc   : > { %v1834_v25 = vpack.c.bf16 %v917_v22, %v915_v21  ;;  %v1836_v26 = vpack.c.bf16 %v922_v24, %v920_v23  ;;  %v919_v27 = vld [vmem:[#allocation10 + $0x140] sm:$0xff]  ;;  %v924_v29 = vld [vmem:[#allocation10 + $0x168] sm:$0xff]  ;;  %v925_v34 = vld [vmem:[#allocation10 + $0x170] sm:$0xff] }
  0xbd   : > { %1811 = vmatpush3.bf16.msra.mxu1 %v1808_v40  ;;  %v1838_v31 = vpack.c.bf16 %v921_v28, %v919_v27  ;;  %v1840_v32 = vpack.c.bf16 %v926_v30, %v924_v29  ;;  %v923_v33 = vld [vmem:[#allocation10 + $0x160] sm:$0xff]  ;;  %v928_v35 = vld [vmem:[#allocation10 + $0x188] sm:$0xff]  ;;  %v929_v40 = vld [vmem:[#allocation10 + $0x190] sm:$0xff] }
  0xbe   : > { %1779 = vmatpush3.bf16.msra.mxu0 %v1776_v36  ;;  %1813 = vmatprep.subr.bf16.mxu1 %v1812_v46  ;;  %v930_v36 = vld [vmem:[#allocation10 + $0x198] sm:$0xff]  ;;  %v1842_v37 = vpack.c.bf16 %v925_v34, %v923_v33  ;;  %v927_v39 = vld [vmem:[#allocation10 + $0x180] sm:$0xff]  ;;  %v932_v41 = vld [vmem:[#allocation10 + $0x1a8] sm:$0xff] }
  0xbf   : > { %1781 = vmatprep.subr.bf16.mxu0 %v1780_v43  ;;  %v1844_v38 = vpack.c.bf16 %v930_v36, %v928_v35  ;;  %v934_v42 = vld [vmem:[#allocation10 + $0x1b8] sm:$0xff]  ;;  %v931_v45 = vld [vmem:[#allocation10 + $0x1a0] sm:$0xff]  ;;  %v936_v47 = vld [vmem:[#allocation10 + $0x1c8] sm:$0xff] }
  0xc0   : > { %v1848_v44 = vpack.c.bf16 %v934_v42, %v932_v41  ;;  %v938_v48 = vld [vmem:[#allocation10 + $0x1d8] sm:$0xff]  ;;  %v935_v51 = vld [vmem:[#allocation10 + $0x1c0] sm:$0xff]  ;;  %v878_v1 = vld [vmem:[#allocation10 + $0x10] sm:$0xff] }
  0xc1   : > { %1815 = vmatpush3.bf16.msra.mxu1 %v1812_v46  ;;  %v933_v46 = vld [vmem:[#allocation10 + $0x1b0] sm:$0xff]  ;;  %v1852_v50 = vpack.c.bf16 %v938_v48, %v936_v47  ;;  %v939_v57 = vld [vmem:[#allocation10 + $0x1e0] sm:$0xff]  ;;  %v879_v60 = vld [vmem:[#allocation10 + $0x18] sm:$0xff] }
  0xc2   : > { %1783 = vmatpush3.bf16.msra.mxu0 %v1780_v43  ;;  %1817 = vmatprep.subr.bf16.mxu1 %v1816_v52  ;;  %v1846_v43 = vpack.c.bf16 %v929_v40, %v927_v39  ;;  %v876_v63 = vld [vmem:[#allocation10] sm:$0xff]  ;;  %v883_v3 = vld [vmem:[#allocation10 + $0x38] sm:$0xff]  ;;  %v886_v15 = vld [vmem:[#allocation10 + $0x50] sm:$0xff] }
  0xc3   : > { %1785 = vmatprep.subr.bf16.mxu0 %v1784_v49  ;;  %v1862_v4 = vpack.c.bf16 %v878_v1, %v876_v63  ;;  %v884_v13 = vld [vmem:[#allocation10 + $0x40] sm:$0xff]  ;;  %v889_v16 = vld [vmem:[#allocation10 + $0x68] sm:$0xff]  ;;  %v890_v21 = vld [vmem:[#allocation10 + $0x70] sm:$0xff] }
  0xc4   : > { %v893_v22 = vld [vmem:[#allocation10 + $0x88] sm:$0xff]  ;;  %v895_v23 = vld [vmem:[#allocation10 + $0x98] sm:$0xff]  ;;  %v894_v27 = vld [vmem:[#allocation10 + $0x90] sm:$0xff] }
  0xc5   : > { %1708 = vmatmul.mubr.msk.f32.vlgmr.msra.gmra.mrb[0].mxu0 %vm470_vm1, %v474_v53  ;;  %1819 = vmatpush3.bf16.msra.mxu1 %v1816_v52  ;;  %v937_v52 = vld [vmem:[#allocation10 + $0x1d0] sm:$0xff]  ;;  %v940_v53 = vld [vmem:[#allocation10 + $0x1e8] sm:$0xff]  ;;  %v899_v29 = vld [vmem:[#allocation10 + $0xb8] sm:$0xff] }
  0xc6   : > { %1787 = vmatpush3.bf16.msra.mxu0 %v1784_v49  ;;  %1722 = vmatprep.mubr.msk.f32.mxu0 %vm470_vm1, %v652_v55  ;;  %v1850_v49 = vpack.c.bf16 %v933_v46, %v931_v45  ;;  %v1854_v55 = vpack.c.bf16 %v937_v52, %v935_v51  ;;  %v897_v28 = vld [vmem:[#allocation10 + $0xa8] sm:$0xff]  ;;  %v898_v33 = vld [vmem:[#allocation10 + $0xb0] sm:$0xff]  ;;  %v903_v35 = vld [vmem:[#allocation10 + $0xd8] sm:$0xff] }
  0xc7   : > { %1789 = vmatprep.subr.bf16.mxu0 %v1788_v54  ;;  %1821 = vmatprep.subr.bf16.mxu1 %v1820_v62  ;;  %v901_v34 = vld [vmem:[#allocation10 + $0xc8] sm:$0xff]  ;;  %v902_v39 = vld [vmem:[#allocation10 + $0xd0] sm:$0xff]  ;;  %v907_v41 = vld [vmem:[#allocation10 + $0xf8] sm:$0xff] }
  0xc8   : > { %v905_v40 = vld [vmem:[#allocation10 + $0xe8] sm:$0xff]  ;;  %v906_v45 = vld [vmem:[#allocation10 + $0xf0] sm:$0xff]  ;;  %v1103_v47 = vld [vmem:[#allocation10 + $0x218] sm:$0xff] }
  0xc9   : > { %1823 = vmatpush3.bf16.msra.mxu1 %v1820_v62  ;;  %v1101_v46 = vld [vmem:[#allocation10 + $0x208] sm:$0xff]  ;;  %v1102_v51 = vld [vmem:[#allocation10 + $0x210] sm:$0xff]  ;;  %v1108_v63 = vld [vmem:[#allocation10 + $0x240] sm:$0xff] }
  0xca   : > { %1791 = vmatpush3.bf16.msra.mxu0 %v1788_v54  ;;  %1825 = vmatprep.subr.bf16.mxu1 %v1824_v2  ;;  %v942_v54 = vld [vmem:[#allocation10 + $0x1f8] sm:$0xff]  ;;  %v1105_v52 = vld [vmem:[#allocation10 + $0x228] sm:$0xff]  ;;  %v1110_v1 = vld [vmem:[#allocation10 + $0x250] sm:$0xff] }
  0xcb   : > { %1793 = vmatprep.subr.bf16.mxu0 %v1792_v58  ;;  %v1856_v56 = vpack.c.bf16 %v942_v54, %v940_v53  ;;  %v1107_v53 = vld [vmem:[#allocation10 + $0x238] sm:$0xff] }
  0xcd   : > { %1827 = vmatpush3.bf16.msra.mxu1 %v1824_v2  ;;  %v881_v2 = vld [vmem:[#allocation10 + $0x28] sm:$0xff] }
  0xce   : > { %1795 = vmatpush3.bf16.msra.mxu0 %v1792_v58  ;;  %1829 = vmatprep.subr.bf16.mxu1 %v1828_v5  ;;  %v941_v58 = vld [vmem:[#allocation10 + $0x1f0] sm:$0xff]  ;;  %v1864_v5 = vpack.c.bf16 %v883_v3, %v881_v2  ;;  %v1113_v3 = vld [vmem:[#allocation10 + $0x268] sm:$0xff] }
  0xcf   : > { %v1858_v61 = vpack.c.bf16 %v941_v58, %v939_v57  ;;  %v1106_v57 = vld [vmem:[#allocation10 + $0x230] sm:$0xff] }
  0xd1   : > { %1723 = vmatmul.mubr.msk.f32.vlgmr.msra.gmra.mrb[0].mxu0 %vm470_vm1, %v653_v59  ;;  %v877_v59 = vld [vmem:[#allocation10 + $0x8] sm:$0xff] }
  0xd2   : > { %v1860_v62 = vpack.c.bf16 %v879_v60, %v877_v59  ;;  %v1109_v59 = vld [vmem:[#allocation10 + $0x248] sm:$0xff]  ;;  %v1111_v60 = vld [vmem:[#allocation10 + $0x258] sm:$0xff] }
 0x1a4   : > { %v1724_v7 = vpop.f32.mrb[0].mxu0 }
 0x1a5   : > { %v752_v8 = vadd.f32 %v1724_v7, %v1626_v6  ;;  %v733_v9 = vpop.f32.mrb[1].mxu0  ;;  %v882_v7 = vld [vmem:[#allocation10 + $0x30] sm:$0xff] }
 0x1a6   : > { %v751_v10 = vadd.f32 %v1626_v6, %v733_v9  ;;  %v880_v6 = vld [vmem:[#allocation10 + $0x20] sm:$0xff]  ;;  %v887_v9 = vld [vmem:[#allocation10 + $0x58] sm:$0xff] }
 0x1a7   : > { %v2715_v11 = vmax.f32 %v752_v8, 0.0  ;;  %v885_v8 = vld [vmem:[#allocation10 + $0x48] sm:$0xff] }
 0x1a8   : > { %v2717_v14 = vmax.f32 %v751_v10, 0.0  ;;  %v1866_v10 = vpack.c.bf16 %v882_v7, %v880_v6  ;;  %v1868_v12 = vpack.c.bf16 %v887_v9, %v885_v8  ;;  %v1112_v7 = vld [vmem:[#allocation10 + $0x260] sm:$0xff]  ;;  %v1114_v8 = vld [vmem:[#allocation10 + $0x270] sm:$0xff]  ;;  %v1117_v9 = vld [vmem:[#allocation10 + $0x288] sm:$0xff] }
 0x1a9   : > { %873 = vst [vmem:[#allocation3 + $0x9] sm:$0xff] %v2715_v11  ;;  %v756_v19 = vmul.f32 %v2715_v11, %v2715_v11 }
 0x1aa   : > { %872 = vst [vmem:[#allocation3 + $0x1] sm:$0xff] %v2717_v14  ;;  %v755_v17 = vmul.f32 %v2717_v14, %v2717_v14 }
 0x1ac   : > { %1757 = vmatprep.mubr.f32.mxu1 %v755_v17  ;;  %v891_v17 = vld [vmem:[#allocation10 + $0x78] sm:$0xff] }
 0x1ad   : > { %1758 = vmatmul.mubr.f32.vlgmr.msra.gmra.mrb[0].mxu1 %v756_v19  ;;  %v1872_v19 = vpack.c.bf16 %v891_v17, %v889_v16  ;;  %v1118_v16 = vld [vmem:[#allocation10 + $0x290] sm:$0xff]  ;;  %v1121_v17 = vld [vmem:[#allocation10 + $0x2a8] sm:$0xff] }
 0x1ae   : > { %1831 = vmatpush1.bf16.msra.mxu1 %v1830_v18  ;;  %1007 = vmatprep.mubr.f32.mxu1 %v2384_v0  ;;  %v1870_v18 = vpack.c.bf16 %v886_v15, %v884_v13  ;;  %v1116_v15 = vld [vmem:[#allocation10 + $0x280] sm:$0xff] }
 0x1af   : > { %1833 = vmatprep.subr.bf16.mxu1 %v1832_v20  ;;  %v888_v20 = vld [vmem:[#allocation10 + $0x60] sm:$0xff] }
 0x1b0   : > { %v1874_v24 = vpack.c.bf16 %v890_v21, %v888_v20  ;;  %v1120_v21 = vld [vmem:[#allocation10 + $0x2a0] sm:$0xff] }
 0x1b1   : > { %v874_v58 = vld [vmem:[#allocation3] sm:$0xff]  ;;  %v875_v2 = vld [vmem:[#allocation3 + $0x8] sm:$0xff] }
 0x1b2   : > { %1835 = vmatpush1.bf16.msra.mxu1 %v1834_v25  ;;  %v1876_v25 = vpack.c.bf16 %v895_v23, %v893_v22  ;;  %v1122_v22 = vld [vmem:[#allocation10 + $0x2b0] sm:$0xff]  ;;  %v1125_v23 = vld [vmem:[#allocation10 + $0x2c8] sm:$0xff] }
 0x1b3   : > { %1837 = vmatprep.subr.bf16.mxu1 %v1836_v26  ;;  %v892_v26 = vld [vmem:[#allocation10 + $0x80] sm:$0xff] }
 0x1b4   : > { %v1878_v30 = vpack.c.bf16 %v894_v27, %v892_v26  ;;  %v1124_v27 = vld [vmem:[#allocation10 + $0x2c0] sm:$0xff] }
 0x1b6   : > { %1839 = vmatpush1.bf16.msra.mxu1 %v1838_v31  ;;  %v1880_v31 = vpack.c.bf16 %v899_v29, %v897_v28  ;;  %v1126_v28 = vld [vmem:[#allocation10 + $0x2d0] sm:$0xff]  ;;  %v1129_v29 = vld [vmem:[#allocation10 + $0x2e8] sm:$0xff] }
 0x1b7   : > { %1841 = vmatprep.subr.bf16.mxu1 %v1840_v32  ;;  %v896_v32 = vld [vmem:[#allocation10 + $0xa0] sm:$0xff] }
 0x1b8   : > { %v1882_v36 = vpack.c.bf16 %v898_v33, %v896_v32  ;;  %v1128_v33 = vld [vmem:[#allocation10 + $0x2e0] sm:$0xff] }
 0x1ba   : > { %1843 = vmatpush1.bf16.msra.mxu1 %v1842_v37  ;;  %v1884_v37 = vpack.c.bf16 %v903_v35, %v901_v34  ;;  %v1130_v34 = vld [vmem:[#allocation10 + $0x2f0] sm:$0xff] }
 0x1bb   : > { %1845 = vmatprep.subr.bf16.mxu1 %v1844_v38  ;;  %v900_v38 = vld [vmem:[#allocation10 + $0xc0] sm:$0xff]  ;;  %v1922_v35 = vpack.c.bf16 %v1130_v34, %v1128_v33  ;;  %v1275_v34 = vld [vmem:[#allocation12 + $0x130] sm:$0xff] }
 0x1bc   : > { %v1886_v42 = vpack.c.bf16 %v902_v39, %v900_v38  ;;  %v1238_v38 = vld [vmem:[#allocation12 + $0x8] sm:$0xff]  ;;  %v1240_v39 = vld [vmem:[#allocation12 + $0x18] sm:$0xff]  ;;  %v1273_v33 = vld [vmem:[#allocation12 + $0x120] sm:$0xff] }
 0x1be   : > { %1847 = vmatpush1.bf16.msra.mxu1 %v1846_v43  ;;  %v1888_v43 = vpack.c.bf16 %v907_v41, %v905_v40  ;;  %v1237_v40 = vld [vmem:[#allocation12] sm:$0xff]  ;;  %v1924_v41 = vpack.c.bf16 %v1240_v39, %v1238_v38 }
 0x1bf   : > { %1849 = vmatprep.subr.bf16.mxu1 %v1848_v44  ;;  %v904_v44 = vld [vmem:[#allocation10 + $0xe0] sm:$0xff] }
 0x1c0   : > { %v1890_v48 = vpack.c.bf16 %v906_v45, %v904_v44  ;;  %v1244_v44 = vld [vmem:[#allocation12 + $0x38] sm:$0xff]  ;;  %1925 = vmatprep.subr.bf16.mxu0 %v1924_v41  ;;  %v1277_v39 = vld [vmem:[#allocation12 + $0x140] sm:$0xff]  ;;  %v1282_v41 = vld [vmem:[#allocation12 + $0x168] sm:$0xff] }
 0x1c2   : > { %1851 = vmatpush1.bf16.msra.mxu1 %v1850_v49  ;;  %v1892_v49 = vpack.c.bf16 %v1103_v47, %v1101_v46  ;;  %v1241_v47 = vld [vmem:[#allocation12 + $0x20] sm:$0xff] }
 0x1c3   : > { %1853 = vmatprep.subr.bf16.mxu1 %v1852_v50  ;;  %v1100_v50 = vld [vmem:[#allocation10 + $0x200] sm:$0xff] }
 0x1c4   : > { %v1894_v54 = vpack.c.bf16 %v1102_v51, %v1100_v50  ;;  %v1248_v50 = vld [vmem:[#allocation12 + $0x58] sm:$0xff] }
 0x1c6   : > { %1855 = vmatpush1.bf16.msra.mxu1 %v1854_v55  ;;  %v1896_v55 = vpack.c.bf16 %v1107_v53, %v1105_v52  ;;  %v1245_v52 = vld [vmem:[#allocation12 + $0x40] sm:$0xff]  ;;  %v1247_v53 = vld [vmem:[#allocation12 + $0x50] sm:$0xff] }
 0x1c7   : > { %1857 = vmatprep.subr.bf16.mxu1 %v1856_v56  ;;  %v1104_v56 = vld [vmem:[#allocation10 + $0x220] sm:$0xff] }
 0x1ca   : > { %1859 = vmatpush1.bf16.msra.mxu1 %v1858_v61  ;;  %v1898_v61 = vpack.c.bf16 %v1106_v57, %v1104_v56  ;;  %v1934_v56 = vpack.c.bf16 %v1247_v53, %v1245_v52  ;;  %v1290_v52 = vld [vmem:[#allocation12 + $0x1a8] sm:$0xff]  ;;  %v1292_v53 = vld [vmem:[#allocation12 + $0x1b8] sm:$0xff] }
 0x1cb   : > { %1861 = vmatprep.subr.bf16.mxu1 %v1860_v62  ;;  %v1900_v62 = vpack.c.bf16 %v1111_v60, %v1109_v59  ;;  %v1251_v59 = vld [vmem:[#allocation12 + $0x70] sm:$0xff]  ;;  %v1254_v60 = vld [vmem:[#allocation12 + $0x88] sm:$0xff] }
 0x1cd   : > { %1008 = vmatmul.mubr.f32.vlgmr.msra.gmra.mrb[2].mxu1 %v2717_v14 }
 0x1ce   : > { %1863 = vmatpush1.bf16.msra.mxu1 %v1862_v4  ;;  %1013 = vmatprep.mubr.f32.mxu1 %v2384_v0  ;;  %v1115_v4 = vld [vmem:[#allocation10 + $0x278] sm:$0xff] }
 0x1cf   : > { %1865 = vmatprep.subr.bf16.mxu1 %v1864_v5  ;;  %v1902_v5 = vpack.c.bf16 %v1110_v1, %v1108_v63  ;;  %v1904_v6 = vpack.c.bf16 %v1115_v4, %v1113_v3  ;;  %v1253_v1 = vld [vmem:[#allocation12 + $0x80] sm:$0xff]  ;;  %v1258_v3 = vld [vmem:[#allocation12 + $0xa8] sm:$0xff]  ;;  %v1260_v4 = vld [vmem:[#allocation12 + $0xb8] sm:$0xff] }
 0x1d1   : > { %1014 = vmatmul.mubr.f32.gmra.mrb[4].mxu1 %v2715_v11 }
 0x1d2   : > { %1867 = vmatpush1.bf16.msra.mxu1 %v1866_v10  ;;  %1084 = vmatprep.mubr.f32.mxu1 %v2384_v0  ;;  %v1119_v10 = vld [vmem:[#allocation10 + $0x298] sm:$0xff] }
 0x1d3   : > { %1869 = vmatprep.subr.bf16.mxu1 %v1868_v12  ;;  %v1906_v12 = vpack.c.bf16 %v1114_v8, %v1112_v7  ;;  %v1908_v13 = vpack.c.bf16 %v1119_v10, %v1117_v9  ;;  %v1257_v7 = vld [vmem:[#allocation12 + $0xa0] sm:$0xff]  ;;  %v1259_v8 = vld [vmem:[#allocation12 + $0xb0] sm:$0xff]  ;;  %v1262_v9 = vld [vmem:[#allocation12 + $0xc8] sm:$0xff] }
 0x1d4   : > { %v1264_v10 = vld [vmem:[#allocation12 + $0xd8] sm:$0xff] }
 0x1d6   : > { %1871 = vmatpush1.bf16.msra.mxu1 %v1870_v18  ;;  %v1123_v18 = vld [vmem:[#allocation10 + $0x2b8] sm:$0xff] }
 0x1d7   : > { %1873 = vmatprep.subr.bf16.mxu1 %v1872_v19  ;;  %v1910_v19 = vpack.c.bf16 %v1118_v16, %v1116_v15  ;;  %v1912_v20 = vpack.c.bf16 %v1123_v18, %v1121_v17  ;;  %v1261_v15 = vld [vmem:[#allocation12 + $0xc0] sm:$0xff]  ;;  %v1263_v16 = vld [vmem:[#allocation12 + $0xd0] sm:$0xff]  ;;  %v1266_v17 = vld [vmem:[#allocation12 + $0xe8] sm:$0xff] }
 0x1d8   : > { %v1268_v18 = vld [vmem:[#allocation12 + $0xf8] sm:$0xff] }
 0x1da   : > { %1875 = vmatpush1.bf16.msra.mxu1 %v1874_v24  ;;  %v1127_v24 = vld [vmem:[#allocation10 + $0x2d8] sm:$0xff] }
 0x1db   : > { %1877 = vmatprep.subr.bf16.mxu1 %v1876_v25  ;;  %v1914_v25 = vpack.c.bf16 %v1122_v22, %v1120_v21  ;;  %v1916_v26 = vpack.c.bf16 %v1127_v24, %v1125_v23  ;;  %v1265_v21 = vld [vmem:[#allocation12 + $0xe0] sm:$0xff]  ;;  %v1267_v22 = vld [vmem:[#allocation12 + $0xf0] sm:$0xff]  ;;  %v1270_v23 = vld [vmem:[#allocation12 + $0x108] sm:$0xff] }
 0x1dc   : > { %v1272_v24 = vld [vmem:[#allocation12 + $0x118] sm:$0xff] }
 0x1de   : > { %1879 = vmatpush1.bf16.msra.mxu1 %v1878_v30  ;;  %v1131_v30 = vld [vmem:[#allocation10 + $0x2f8] sm:$0xff] }
 0x1df   : > { %1881 = vmatprep.subr.bf16.mxu1 %v1880_v31  ;;  %v1918_v31 = vpack.c.bf16 %v1126_v28, %v1124_v27  ;;  %v1920_v32 = vpack.c.bf16 %v1131_v30, %v1129_v29  ;;  %v1269_v27 = vld [vmem:[#allocation12 + $0x100] sm:$0xff]  ;;  %v1271_v28 = vld [vmem:[#allocation12 + $0x110] sm:$0xff]  ;;  %v1274_v29 = vld [vmem:[#allocation12 + $0x128] sm:$0xff] }
 0x1e0   : > { %v1276_v30 = vld [vmem:[#allocation12 + $0x138] sm:$0xff] }
 0x1e2   : > { %1883 = vmatpush1.bf16.msra.mxu1 %v1882_v36  ;;  %v1097_v36 = vld [vmem:[#allocation3 + $0x2] sm:$0xff] }
 0x1e3   : > { %1885 = vmatprep.subr.bf16.mxu1 %v1884_v37  ;;  %v1098_v37 = vld [vmem:[#allocation3 + $0xa] sm:$0xff] }
 0x1e6   : > { %1887 = vmatpush1.bf16.msra.mxu1 %v1886_v42  ;;  %v1239_v42 = vld [vmem:[#allocation12 + $0x10] sm:$0xff] }
 0x1e7   : > { %1889 = vmatprep.subr.bf16.mxu1 %v1888_v43  ;;  %v1242_v43 = vld [vmem:[#allocation12 + $0x28] sm:$0xff]  ;;  %v1926_v45 = vpack.c.bf16 %v1239_v42, %v1237_v40  ;;  %v1279_v40 = vld [vmem:[#allocation12 + $0x150] sm:$0xff]  ;;  %v1284_v42 = vld [vmem:[#allocation12 + $0x178] sm:$0xff] }
 0x1e8   : > { %v1928_v46 = vpack.c.bf16 %v1244_v44, %v1242_v43  ;;  %v1966_v43 = vpack.c.bf16 %v1279_v40, %v1277_v39  ;;  %v1968_v44 = vpack.c.bf16 %v1284_v42, %v1282_v41 }
 0x1e9   : > { %1927 = vmatpush1.bf16.msra.mxu0 %v1926_v45  ;;  %v1281_v45 = vld [vmem:[#allocation12 + $0x160] sm:$0xff] }
 0x1ea   : > { %1891 = vmatpush1.bf16.msra.mxu1 %v1890_v48  ;;  %v1243_v48 = vld [vmem:[#allocation12 + $0x30] sm:$0xff]  ;;  %1929 = vmatprep.subr.bf16.mxu0 %v1928_v46 }
 0x1eb   : > { %1893 = vmatprep.subr.bf16.mxu1 %v1892_v49  ;;  %v1246_v49 = vld [vmem:[#allocation12 + $0x48] sm:$0xff]  ;;  %v1930_v51 = vpack.c.bf16 %v1243_v48, %v1241_v47  ;;  %v1283_v46 = vld [vmem:[#allocation12 + $0x170] sm:$0xff]  ;;  %v1288_v48 = vld [vmem:[#allocation12 + $0x198] sm:$0xff] }
 0x1ec   : > { %v1286_v47 = vld [vmem:[#allocation12 + $0x188] sm:$0xff] }
 0x1ed   : > { %1085 = vmatmul.mubr.f32.vlgmr.msra.gmra.mrb[2].mxu1 %v874_v58  ;;  %1931 = vmatpush1.bf16.msra.mxu0 %v1930_v51  ;;  %v1249_v58 = vld [vmem:[#allocation12 + $0x60] sm:$0xff] }
 0x1ee   : > { %1895 = vmatpush1.bf16.msra.mxu1 %v1894_v54  ;;  %1090 = vmatprep.mubr.f32.mxu1 %v2384_v0  ;;  %v1250_v54 = vld [vmem:[#allocation12 + $0x68] sm:$0xff]  ;;  %v1285_v51 = vld [vmem:[#allocation12 + $0x180] sm:$0xff] }
 0x1ef   : > { %1897 = vmatprep.subr.bf16.mxu1 %v1896_v55  ;;  %v1252_v55 = vld [vmem:[#allocation12 + $0x78] sm:$0xff] }
 0x1f0   : > { %v1936_v57 = vpack.c.bf16 %v1252_v55, %v1250_v54  ;;  %v1976_v55 = vpack.c.bf16 %v1292_v53, %v1290_v52 }
 0x1f1   : > { %1091 = vmatmul.mubr.f32.gmra.mrb[4].mxu1 %v875_v2  ;;  %v1255_v2 = vld [vmem:[#allocation12 + $0x90] sm:$0xff] }
 0x1f2   : > { %1899 = vmatpush1.bf16.msra.mxu1 %v1898_v61  ;;  %1196 = vmatprep.mubr.f32.mxu1 %v2384_v0  ;;  %v1256_v61 = vld [vmem:[#allocation12 + $0x98] sm:$0xff] }
 0x1f3   : > { %1901 = vmatprep.subr.bf16.mxu1 %v1900_v62  ;;  %v1938_v62 = vpack.c.bf16 %v1251_v59, %v1249_v58  ;;  %v1940_v63 = vpack.c.bf16 %v1256_v61, %v1254_v60  ;;  %v1294_v59 = vld [vmem:[#allocation12 + $0x1c8] sm:$0xff]  ;;  %v1296_v60 = vld [vmem:[#allocation12 + $0x1d8] sm:$0xff] }
 0x1f4   : > { %v1980_v61 = vpack.c.bf16 %v1296_v60, %v1294_v59 }
 0x1f6   : > { %1903 = vmatpush1.bf16.msra.mxu1 %v1902_v5  ;;  %v1942_v5 = vpack.c.bf16 %v1255_v2, %v1253_v1  ;;  %v1298_v2 = vld [vmem:[#allocation12 + $0x1e8] sm:$0xff] }
 0x1f7   : > { %1905 = vmatprep.subr.bf16.mxu1 %v1904_v6  ;;  %v1944_v6 = vpack.c.bf16 %v1260_v4, %v1258_v3  ;;  %v1300_v3 = vld [vmem:[#allocation12 + $0x1f8] sm:$0xff] }
 0x1f8   : > { %v1984_v4 = vpack.c.bf16 %v1300_v3, %v1298_v2 }
 0x1fa   : > { %1907 = vmatpush1.bf16.msra.mxu1 %v1906_v12  ;;  %v1946_v12 = vpack.c.bf16 %v1259_v8, %v1257_v7 }
 0x1fb   : > { %1909 = vmatprep.subr.bf16.mxu1 %v1908_v13  ;;  %v1948_v13 = vpack.c.bf16 %v1264_v10, %v1262_v9 }
 0x1fe   : > { %1911 = vmatpush1.bf16.msra.mxu1 %v1910_v19  ;;  %v1950_v19 = vpack.c.bf16 %v1263_v16, %v1261_v15 }
 0x1ff   : > { %1913 = vmatprep.subr.bf16.mxu1 %v1912_v20  ;;  %v1952_v20 = vpack.c.bf16 %v1268_v18, %v1266_v17 }
 0x202   : > { %1915 = vmatpush1.bf16.msra.mxu1 %v1914_v25  ;;  %v1954_v25 = vpack.c.bf16 %v1267_v22, %v1265_v21 }
 0x203   : > { %1917 = vmatprep.subr.bf16.mxu1 %v1916_v26  ;;  %v1956_v26 = vpack.c.bf16 %v1272_v24, %v1270_v23 }
 0x206   : > { %1919 = vmatpush1.bf16.msra.mxu1 %v1918_v31  ;;  %v1958_v31 = vpack.c.bf16 %v1271_v28, %v1269_v27  ;;  %v1215_v28 = vlaneseq }
 0x207   : > { %1921 = vmatprep.subr.bf16.mxu1 %v1920_v32  ;;  %v1960_v32 = vpack.c.bf16 %v1276_v30, %v1274_v29 }
 0x208   : > { %v1216_v29 = vshrl.u32 %v1215_v28, 7 }
 0x20a   : > { %1923 = vmatpush1.bf16.msra.mxu1 %v1922_v35  ;;  %v1278_v35 = vld [vmem:[#allocation12 + $0x148] sm:$0xff]  ;;  %v1217_v30 = vsub.s32 0, %v1216_v29 }
 0x20d   : > { %1197 = vmatmul.mubr.f32.vlgmr.msra.gmra.mrb[2].mxu1 %v1097_v36  ;;  %v1280_v36 = vld [vmem:[#allocation12 + $0x158] sm:$0xff] }
 0x20e   : > { %1202 = vmatprep.mubr.f32.mxu1 %v2384_v0  ;;  %v1932_v0 = vpack.c.bf16 %v1248_v50, %v1246_v49  ;;  %v1964_v38 = vpack.c.bf16 %v1280_v36, %v1278_v35  ;;  %v1970_v49 = vpack.c.bf16 %v1283_v46, %v1281_v45  ;;  %v1972_v50 = vpack.c.bf16 %v1288_v48, %v1286_v47 }
 0x210   : > { %1933 = vmatprep.subr.bf16.mxu0 %v1932_v0  ;;  %v1287_v0 = vld [vmem:[#allocation12 + $0x190] sm:$0xff] }
 0x211   : > { %1203 = vmatmul.mubr.f32.gmra.mrb[4].mxu1 %v1098_v37  ;;  %1935 = vmatpush1.bf16.msra.mxu0 %v1934_v56  ;;  %v1962_v37 = vpack.c.bf16 %v1275_v34, %v1273_v33  ;;  %v1974_v54 = vpack.c.bf16 %v1287_v0, %v1285_v51  ;;  %v1289_v56 = vld [vmem:[#allocation12 + $0x1a0] sm:$0xff] }
 0x212   : > { %1937 = vmatprep.subr.bf16.mxu0 %v1936_v57  ;;  %v1291_v57 = vld [vmem:[#allocation12 + $0x1b0] sm:$0xff] }
 0x213   : > { %v1978_v58 = vpack.c.bf16 %v1291_v57, %v1289_v56 }
 0x215   : > { %1939 = vmatpush1.bf16.msra.mxu0 %v1938_v62  ;;  %v1293_v62 = vld [vmem:[#allocation12 + $0x1c0] sm:$0xff] }
 0x216   : > { %1941 = vmatprep.subr.bf16.mxu0 %v1940_v63  ;;  %v1295_v63 = vld [vmem:[#allocation12 + $0x1d0] sm:$0xff] }
 0x217   : > { %v1982_v1 = vpack.c.bf16 %v1295_v63, %v1293_v62 }
 0x219   : > { %1943 = vmatpush1.bf16.msra.mxu0 %v1942_v5  ;;  %v1297_v5 = vld [vmem:[#allocation12 + $0x1e0] sm:$0xff] }
 0x21a   : > { %1945 = vmatprep.subr.bf16.mxu0 %v1944_v6  ;;  %v1299_v6 = vld [vmem:[#allocation12 + $0x1f0] sm:$0xff] }
 0x21b   : > { %v1986_v7 = vpack.c.bf16 %v1299_v6, %v1297_v5 }
 0x21d   : > { %1947 = vmatpush1.bf16.msra.mxu0 %v1946_v12 }
 0x21e   : > { %1949 = vmatprep.subr.bf16.mxu0 %v1948_v13 }
 0x221   : > { %1951 = vmatpush1.bf16.msra.mxu0 %v1950_v19 }
 0x222   : > { %1953 = vmatprep.subr.bf16.mxu0 %v1952_v20 }
 0x225   : > { %1955 = vmatpush1.bf16.msra.mxu0 %v1954_v25 }
 0x226   : > { %1957 = vmatprep.subr.bf16.mxu0 %v1956_v26 }
 0x229   : > { %1959 = vmatpush1.bf16.msra.mxu0 %v1958_v31  ;;  %v1213_v31 = vld [vmem:[%s2855_s7] sm:$0x3] }
 0x22a   : > { %1961 = vmatprep.subr.bf16.mxu0 %v1960_v32  ;;  %v1221_v32 = vsub.s32 1, %v1216_v29  ;;  %v1218_v33 = vrot.slane %v1213_v31, %v1217_v30 }
 0x22c   : > { %v1222_v34 = vrot.slane %v1213_v31, %v1221_v32 }
 0x22d   : > { %1963 = vmatpush1.bf16.msra.mxu0 %v1962_v37 }
 0x22e   : > { %1965 = vmatprep.subr.bf16.mxu0 %v1964_v38 }
 0x231   : > { %1967 = vmatpush1.bf16.msra.mxu0 %v1966_v43 }
 0x232   : > { %1969 = vmatprep.subr.bf16.mxu0 %v1968_v44 }
 0x235   : > { %1971 = vmatpush1.bf16.msra.mxu0 %v1970_v49 }
 0x236   : > { %1973 = vmatprep.subr.bf16.mxu0 %v1972_v50 }
 0x239   : > { %1975 = vmatpush1.bf16.msra.mxu0 %v1974_v54 }
 0x23a   : > { %1977 = vmatprep.subr.bf16.mxu0 %v1976_v55 }
 0x23d   : > { %1979 = vmatpush1.bf16.msra.mxu0 %v1978_v58 }
 0x23e   : > { %1981 = vmatprep.subr.bf16.mxu0 %v1980_v61 }
 0x241   : > { %1983 = vmatpush1.bf16.msra.mxu0 %v1982_v1 }
 0x242   : > { %1985 = vmatprep.subr.bf16.mxu0 %v1984_v4 }
 0x245   : > { %1987 = vmatpush1.bf16.msra.mxu0 %v1986_v7 }
 0x280   : > { %v1759_v8 = vpop.f32.mrb[0].mxu1 }
 0x281   : > { %2101 = vrsqrt.f32 %v1759_v8  ;;  %v839_v9 = vpop.f32.mrb[1].mxu1  ;;  %vm857_vm2 = vcmp.eq.f32.partialorder %v1759_v8, inf  ;;  %v860_v15 = vand.u32 2147483648, %v1759_v8  ;;  %vm859_vm3 = vcmp.eq.f32.partialorder %v1759_v8, 0.0 }
 0x282   : > { %2103 = vrsqrt.f32 %v839_v9  ;;  %vm850_vm4 = vcmp.eq.f32.partialorder %v839_v9, inf  ;;  %v853_v18 = vand.u32 2147483648, %v839_v9  ;;  %vm852_vm5 = vcmp.eq.f32.partialorder %v839_v9, 0.0 }
 0x28b   : > { %v2102_v10 = vpop.eup %2101 }
 0x28c   : > { %v2104_v12 = vpop.eup %2103  ;;  %v856_v13 = vmul.f32 %v2102_v10, %v1759_v8 }
 0x28d   : > { %v849_v16 = vmul.f32 %v2104_v12, %v839_v9 }
 0x28e   : > { %v858_v17 = vsel %vm857_vm2, %v1759_v8, %v856_v13 }
 0x28f   : > { %v861_v19 = vsel %vm859_vm3, %v860_v15, %v858_v17  ;;  %v851_v20 = vsel %vm850_vm4, %v839_v9, %v849_v16 }
 0x290   : > { %v863_v21 = vadd.f32 1e-10, %v861_v19  ;;  %v854_v22 = vsel %vm852_vm5, %v853_v18, %v851_v20 }
 0x291   : > { %v862_v23 = vadd.f32 1e-10, %v854_v22 }
 0x292   : > { %2105 = vrcp.f32 %v863_v21 }
 0x293   : > { %2107 = vrcp.f32 %v862_v23 }
 0x29c   : > { %v2106_v24 = vpop.eup %2105 }
 0x29d   : > { %v2108_v25 = vpop.eup %2107  ;;  %v867_v26 = vmul.f32 %v2106_v24, %v2715_v11 }
 0x29e   : > { %v866_v27 = vmul.f32 %v2108_v25, %v2717_v14 }
 0x29f   : > { %869 = vst [vmem:[%s2737_s12 + $0x8] sm:$0xff] %v867_v26 }
 0x2a0   : > { %868 = vst [vmem:[%s2737_s12] sm:$0xff] %v866_v27 }
 0x2e0   : > { %v1198_v11 = vpop.f32.mrb[2].mxu1 }
 0x2e1   : > { %v1225_v35 = vadd.f32 %v1218_v33, %v1198_v11  ;;  %v1200_v14 = vpop.f32.mrb[3].mxu1 }
 0x2e2   : > { %v1226_v36 = vadd.f32 %v1222_v34, %v1200_v14 }
 0x2e3   : > { %v2744_v37 = vmax.f32 %v1225_v35, 0.0 }
 0x2e4   : > { %v2746_v38 = vmax.f32 %v1226_v36, 0.0  ;;  %v1204_v39 = vpop.f32.mrb[4].mxu1 }
 0x2e5   : > { %v1227_v40 = vadd.f32 %v1218_v33, %v1204_v39  ;;  %v1206_v41 = vpop.f32.mrb[5].mxu1  ;;  %v1233_v44 = vmul.f32 %v2744_v37, %v2744_v37 }
 0x2e6   : > { %v1234_v42 = vmul.f32 %v2746_v38, %v2746_v38  ;;  %v1228_v43 = vadd.f32 %v1222_v34, %v1206_v41 }
 0x2e7   : > { %v2752_v45 = vmax.f32 %v1227_v40, 0.0 }
 0x2e8   : > { %v2754_v46 = vmax.f32 %v1228_v43, 0.0  ;;  %1365 = vmatprep.mubr.f32.mxu0 %v1234_v42 }
 0x2e9   : > { %1366 = vmatmul.mubr.f32.vlgmr.msra.gmra.mrb[2].mxu0 %v1233_v44  ;;  %v1235_v48 = vmul.f32 %v2752_v45, %v2752_v45 }
 0x2ea   : > { %v1236_v47 = vmul.f32 %v2754_v46, %v2754_v46 }
 0x2ec   : > { %1371 = vmatprep.mubr.f32.mxu0 %v1236_v47 }
 0x2ed   : > { %1372 = vmatmul.mubr.f32.gmra.mrb[4].mxu0 %v1235_v48 }
 0x2ee   : > { %2280 = shalt.err (!%p2277_p13)
}
 0x2ef   : > { %s2281_s30 = scalar_lea.hbm %s2764_s20, 256  ;;  %s2285_s26 = scalar_lea.hbm %s2857_s9, 512 }
 0x2f0   : > { %p2282_p9 = scmp.ne.s32.totalorder %s2764_s20, %s2281_s30  ;;  %p2286_p6 = scmp.lt.u32.totalorder %s2764_s20, %s2857_s9 }
 0x2f1   : > { %p2287_p4 = scmp.lt.u32.totalorder %s2285_s26, %s2281_s30  ;;  %p2289_p10 = scmp.lt.u32.totalorder %s2281_s30, %s2764_s20 }
 0x2f2   : > { %p2283_p0 = pnand %p2282_p9, %p2624_p3 }
 0x2f3   : > { %p2288_p8 = por %p2287_p4, %p2286_p6 }
 0x2f4   : > { %p2284_p11 = pneg %p2283_p0 }
 0x2f5   : > { %p2290_p5 = por %p2289_p10, %p2288_p8 }
 0x2f7   : > { %p2291_p7 = pnand %p2290_p5, %p2284_p11 }
 0x2f9   : > { %2294 = shalt.err (!%p2291_p7)
}
 0x2fa   : > { %s2386_s22 = smov 128   ;;  %s2387_s21 = smov 8  }
 0x2fb   : > { %2018 = dma.vmem_to_hbm [thread:$0]  (%p2624_p3), %s2767_s27, 256, %s2764_s20, %s1423_s19, %s2386_s22, %s2386_s22, %s2387_s21  }
 0x2fc   : > { %s1617_s20 = sshll.u32 %s2676_s18, 5  ;;  %s1637_s27 = sshll.u32 %s2467_s17, 9 }
 0x2fd   : > { %s446_s19 = scalar_lea.vmem [#allocation14], %s1617_s20  ;;  %s2892_s30 = sld [smem:[#allocation24_spill]] }
 0x2fe   : > { %s1457_s3 = sshll.u32 %s446_s19, 4  ;;  %s1428_s17 = scalar_lea.sflag [#allocation15], %s2676_s18  ;;  %s2803_s3 = int_to_ptr.vmem [resolvable:$true] %s1457_s3 }
 0x2ff   : > { %s2295_s13 = scalar_lea.vmem %s2803_s3, 512  ;;  %s2388_s26 = smov [#allocation14]  }
 0x300   : > { %p2296_p12 = scmp.ne.s32.totalorder %s2803_s3, %s2295_s13  ;;  %s2299_s10 = sshll.u32 %s2388_s26, 4  ;;  %s2300_s10 = int_to_ptr.vmem [resolvable:$false] %s2299_s10 }
 0x301   : > { %s2301_s29 = scalar_lea.vmem %s2300_s10, 1024  ;;  %p2302_p13 = scmp.lt.s32.totalorder %s2803_s3, %s2300_s10 }
 0x302   : > { %p2297_p1 = pnand %p2296_p12, %p2624_p3  ;;  %p2303_p9 = scmp.lt.s32.totalorder %s2301_s29, %s2295_s13 }
 0x303   : > { %s2801_s12 = scalar_lea.hbm %s2892_s30, %s1637_s27 }
 0x304   : > { %p2298_p2 = pneg %p2297_p1  ;;  %p2304_p0 = por %p2303_p9, %p2302_p13 }
 0x306   : > { %p2305_p11 = pnand %p2304_p0, %p2298_p2 }
 0x3bc   : > { %v1367_v49 = vpop.f32.mrb[2].mxu0 }
 0x3bd   : > { %2109 = vrsqrt.f32 %v1367_v49  ;;  %v1369_v50 = vpop.f32.mrb[3].mxu0  ;;  %vm1380_vm6 = vcmp.eq.f32.partialorder %v1367_v49, inf  ;;  %v1383_v55 = vand.u32 2147483648, %v1367_v49  ;;  %vm1382_vm7 = vcmp.eq.f32.partialorder %v1367_v49, 0.0 }
 0x3be   : > { %2111 = vrsqrt.f32 %v1369_v50  ;;  %vm1387_vm8 = vcmp.eq.f32.partialorder %v1369_v50, inf  ;;  %v1390_v58 = vand.u32 2147483648, %v1369_v50  ;;  %vm1389_vm9 = vcmp.eq.f32.partialorder %v1369_v50, 0.0 }
 0x3c0   : > { %v1373_v51 = vpop.f32.mrb[4].mxu0 }
 0x3c1   : > { %2113 = vrsqrt.f32 %v1373_v51  ;;  %v1375_v0 = vpop.f32.mrb[5].mxu0  ;;  %vm1394_vm10 = vcmp.eq.f32.partialorder %v1373_v51, inf  ;;  %vm1396_vm11 = vcmp.eq.f32.partialorder %v1373_v51, 0.0  ;;  %v1397_v4 = vand.u32 2147483648, %v1373_v51 }
 0x3c2   : > { %2115 = vrsqrt.f32 %v1375_v0  ;;  %vm1401_vm12 = vcmp.eq.f32.partialorder %v1375_v0, inf  ;;  %v1404_v7 = vand.u32 2147483648, %v1375_v0  ;;  %vm1403_vm13 = vcmp.eq.f32.partialorder %v1375_v0, 0.0 }
 0x3c7   : > { %v2110_v52 = vpop.eup %2109 }
 0x3c8   : > { %v2112_v53 = vpop.eup %2111  ;;  %v1379_v54 = vmul.f32 %v2110_v52, %v1367_v49 }
 0x3c9   : > { %v1386_v56 = vmul.f32 %v2112_v53, %v1369_v50 }
 0x3ca   : > { %v1381_v57 = vsel %vm1380_vm6, %v1367_v49, %v1379_v54 }
 0x3cb   : > { %v2114_v59 = vpop.eup %2113  ;;  %v1384_v60 = vsel %vm1382_vm7, %v1383_v55, %v1381_v57  ;;  %v1388_v61 = vsel %vm1387_vm8, %v1369_v50, %v1386_v56 }
 0x3cc   : > { %v2116_v62 = vpop.eup %2115  ;;  %v1406_v63 = vadd.f32 1e-10, %v1384_v60  ;;  %v1391_v1 = vsel %vm1389_vm9, %v1390_v58, %v1388_v61  ;;  %v1393_v2 = vmul.f32 %v2114_v59, %v1373_v51 }
 0x3cd   : > { %v1407_v3 = vadd.f32 1e-10, %v1391_v1  ;;  %v1400_v5 = vmul.f32 %v2116_v62, %v1375_v0 }
 0x3ce   : > { %2117 = vrcp.f32 %v1406_v63  ;;  %v1395_v6 = vsel %vm1394_vm10, %v1373_v51, %v1393_v2 }
 0x3cf   : > { %2119 = vrcp.f32 %v1407_v3  ;;  %v1398_v8 = vsel %vm1396_vm11, %v1397_v4, %v1395_v6  ;;  %v1402_v9 = vsel %vm1401_vm12, %v1375_v0, %v1400_v5 }
 0x3d0   : > { %v1408_v10 = vadd.f32 1e-10, %v1398_v8  ;;  %v1405_v12 = vsel %vm1403_vm13, %v1404_v7, %v1402_v9 }
 0x3d1   : > { %v1409_v13 = vadd.f32 1e-10, %v1405_v12 }
 0x3d2   : > { %2121 = vrcp.f32 %v1408_v10 }
 0x3d3   : > { %2123 = vrcp.f32 %v1409_v13 }
 0x3d8   : > { %v2118_v15 = vpop.eup %2117 }
 0x3d9   : > { %v2120_v16 = vpop.eup %2119  ;;  %v1414_v17 = vmul.f32 %v2118_v15, %v2744_v37 }
 0x3da   : > { %v1415_v18 = vmul.f32 %v2120_v16, %v2746_v38 }
 0x3db   : > { %1418 = vst [vmem:[%s446_s19] sm:$0xff] %v1414_v17 }
 0x3dc   : > { %v2122_v19 = vpop.eup %2121  ;;  %1419 = vst [vmem:[%s446_s19 + $0x8] sm:$0xff] %v1415_v18 }
 0x3dd   : > { %v2124_v20 = vpop.eup %2123  ;;  %v1416_v21 = vmul.f32 %v2122_v19, %v2752_v45 }
 0x3de   : > { %v1417_v22 = vmul.f32 %v2124_v20, %v2754_v46 }
 0x3df   : > { %1420 = vst [vmem:[%s446_s19 + $0x10] sm:$0xff] %v1416_v21 }
 0x3e0   : > { %1421 = vst [vmem:[%s446_s19 + $0x18] sm:$0xff] %v1417_v22 }
 0x3e1   : > { %2308 = shalt.err (!%p2305_p11)
}
 0x3e2   : > { %s2309_s22 = scalar_lea.hbm %s2801_s12, 512  ;;  %s2313_s27 = scalar_lea.hbm %s2892_s30, 1024 }
 0x3e3   : > { %p2310_p6 = scmp.ne.s32.totalorder %s2801_s12, %s2309_s22  ;;  %p2314_p10 = scmp.lt.u32.totalorder %s2801_s12, %s2892_s30 }
 0x3e4   : > { %p2315_p5 = scmp.lt.u32.totalorder %s2313_s27, %s2309_s22  ;;  %p2317_p12 = scmp.lt.u32.totalorder %s2309_s22, %s2801_s12 }
 0x3e5   : > { %p2311_p4 = pnand %p2310_p6, %p2624_p3 }
 0x3e6   : > { %p2316_p7 = por %p2315_p5, %p2314_p10 }
 0x3e7   : > { %p2312_p8 = pneg %p2311_p4 }
 0x3e8   : > { %p2318_p1 = por %p2317_p12, %p2316_p7 }
 0x3ea   : > { %p2319_p2 = pnand %p2318_p1, %p2312_p8 }
 0x3ec   : > { %2322 = shalt.err (!%p2319_p2)
}
 0x3ed   : > { %s2389_s11 = smov 256   ;;  %s2390_s13 = smov 16  }
 0x3ee   : > { %2019 = dma.vmem_to_hbm [thread:$0]  (%p2624_p3), %s2803_s3, 512, %s2801_s12, %s1428_s17, %s2389_s11, %s2389_s11, %s2390_s13  }
 0x3ef PF: > { %s2893_s26 = sld [smem:[#allocation21_spill]]  ;;  %s2894_s10 = sld [smem:[#allocation22_spill]] }
 0x3f0   : > { %p2896_p9 = scmp.ge.s32.totalorder %s2373_s16, 2 }
 0x3f5   : > { %s1472_s29 = sand.u32 1, %s2893_s26   ;;  %p2895_p13 = scmp.ne.s32.totalorder %s2894_s10, 0 }
 0x3f6   : > { %s1473_s22 = scalar_lea.sflag [#allocation6], %s1472_s29 }
 0x3f7   : > { %p2040_p0 = pnand %p2896_p9, %p2895_p13 }
 0x3f9   : > { %2352 = dma.done.wait (!%p2040_p0), %s1473_s22, 256  }
 0x3fa   : > { %2354 = vsyncadd (!%p2040_p0), %s1473_s22, 4294967040  ;;  %s1482_s21 = scalar_lea.sflag [#allocation15], %s1472_s29 }
 0x3fb   : > { %2356 = dma.done.wait (!%p2040_p0), %s1482_s21, 512  }
 0x3fc   : > { %2358 = vsyncadd (!%p2040_p0), %s1482_s21, 4294966784  ;;  %p29_p3 = scmp.ge.s32.totalorder %s2611_s24, 4   ;;  %s2897_s13 = smov %s2365_s14 }
 0x3fd   : > { %s2898_s14 = smov %s2369_s15  ;;  %s2899_s15 = smov %s2620_s25 }
 0x3fe   : > { %s2900_s16 = smov %s2611_s24  ;;  %31 = sbr.rel (!%p29_p3) target bundleno = 12 (0xc), region = 138 }
 0x405   :  { %1487 = vsyncpa [#allocation5], 1 }
 0x406   :  { %1489 = vsyncpa [#allocation5 + $0x1], 1 }
 0x407   :  { %1490 = vsyncpa [#allocation8], 1 }
 0x408   :  { %1491 = vsyncpa [#allocation11], 1 }
 0x409   :  { %1492 = vsyncpa [#allocation6], 1 }
 0x40a   :  { %1494 = vsyncpa [#allocation6 + $0x1], 1 }
 0x40b   :  { %1495 = vsyncpa [#allocation15], 1 }
 0x40c   :  { %1497 = vsyncpa [#allocation15 + $0x1], 1 }

</bundles_post_ra>
